<compile_context>
chip_gen: v5e
topology: v5e:2x2
jax: 0.10.0
libtpu: 0.0.40
codegen_flags: <defaults>
</compile_context>

<pallas_src>
import functools

import jax
import jax.numpy as jnp
from jax.experimental import pallas as pl
from jax.experimental.pallas import tpu as pltpu


def ggnn_kernel(feat_ref, inv_div_ref, adj_hbm_ref, w_sg_ref, b_sg_ref,
                w_msg_ref, b_msg_ref, w_gru_ref, b_gru_ref,
                out_ref, adj_vmem, adj_sem,
                *, n_steps, n_edges, message_dim):
    N, H = out_ref.shape
    M = message_dim
    E = n_edges

    # Kick off the (dominant) adjacency HBM->VMEM DMA immediately; it overlaps
    # the state_generator matmul and the first step's message matmul.
    adj_cp = pltpu.make_async_copy(adj_hbm_ref, adj_vmem, adj_sem)
    adj_cp.start()

    # state_generator: weight/bias pre-padded host-side so one f32 matmul
    # yields the zero-padded (N, H) initial state directly (no lane concat).
    state = jnp.dot(feat_ref[...], w_sg_ref[...],
                    preferred_element_type=jnp.float32) + b_sg_ref[...]

    # Loop-invariant reads hoisted out of the (fully unrolled) step loop.
    inv_div = inv_div_ref[...]          # (N, 1)  f32, exact reciprocal
    b_msg = b_msg_ref[...]              # (1, E*M) f32
    b_gru = b_gru_ref[...]              # (1, 6H)  f32

    if n_steps == 0:                    # keep the DMA balanced even if unused
        adj_cp.wait()

    # n_steps is small & static -> unrolled so the LLO scheduler interleaves
    # MXU pushes / EUP sigmoids across steps.
    for s in range(n_steps):
        # ---- fused message generation: ONE (N,H) x (H,E*M) bf16 matmul ----
        msgs = (jnp.dot(state.astype(jnp.bfloat16), w_msg_ref[...],
                        preferred_element_type=jnp.float32)
                + b_msg).astype(jnp.bfloat16)            # (N, E*M)

        if s == 0:
            adj_cp.wait()               # adjacency needed only from here on

        # ---- spmm: E accumulating (N,N) x (N,M) bf16 matmuls, f32 accum ----
        acc = jnp.dot(adj_vmem[0], msgs[:, 0:M],
                      preferred_element_type=jnp.float32)
        for e in range(1, E):
            acc = acc + jnp.dot(adj_vmem[e], msgs[:, e * M:(e + 1) * M],
                                preferred_element_type=jnp.float32)
        msg_in = acc * inv_div                           # (N, M) f32

        # ---- GRUCell: ONE fused (N, M+H) x (M+H, 6H) bf16 matmul [gi|gh] ---
        x = jnp.concatenate([msg_in, state], axis=1).astype(jnp.bfloat16)
        g = jnp.dot(x, w_gru_ref[...],
                    preferred_element_type=jnp.float32) + b_gru   # (N, 6H)
        r = jax.nn.sigmoid(g[:, 0:H] + g[:, 3 * H:4 * H])
        z = jax.nn.sigmoid(g[:, H:2 * H] + g[:, 4 * H:5 * H])
        n = jnp.tanh(g[:, 2 * H:3 * H] + r * g[:, 5 * H:6 * H])
        state = (1.0 - z) * n + z * state                # f32 epilogue

    out_ref[...] = state


def _tile_padded_bytes(shape, dtype):
    """VMEM bytes of one buffer rounded to the (sublane, 128) physical tile."""
    itemsize = jnp.dtype(dtype).itemsize
    sub = 32 // itemsize                # 8 (f32) / 16 (bf16) sublane tile
    shape = tuple(int(d) for d in shape)
    if len(shape) < 2:
        shape = (1,) * (2 - len(shape)) + shape
    *lead, s, l = shape
    s_pad = -(-s // sub) * sub
    l_pad = -(-l // 128) * 128
    n = 1
    for d in lead:
        n *= d
    return n * s_pad * l_pad * itemsize


def ggnn_forward(var_type, node_tokens, mask, adjacency, params, *,
                 n_steps, n_edges, node_dim, message_dim, annotation_dim):
    # ---- glue: embedding lookups (EmbeddingBag sum w/ per_sample_weights) ---
    tok = params["token_table"][node_tokens]             # (N, L, token_dim)
    tokens = jnp.sum(tok * mask[:, :, None], axis=1)     # (N, token_dim)
    types = params["type_table"][var_type]                # (N, type_dim)
    feat = jnp.concatenate([tokens, types], axis=1).astype(jnp.float32)

    N = feat.shape[0]
    E, M, H, A = n_edges, message_dim, node_dim, annotation_dim

    # divider / exact reciprocal precomputed on the XLA side (loop-invariant);
    # keeps the big adjacency DMA off the kernel's critical path.
    adjacency = adjacency.astype(jnp.float32)
    divider = jnp.maximum(jnp.sum(adjacency, axis=1, keepdims=True), 1.0)
    inv_div = (1.0 / divider).astype(jnp.float32)         # (N, 1)

    # adjacency (N, N*E) with column = node*E + edge  ->  (E, N, N).
    # 0/1 values are exact in bf16: halves the dominant VMEM term and keeps
    # the MXU single-pass.
    adj = adjacency.reshape(N, N, E).transpose(2, 0, 1).astype(jnp.bfloat16)

    # state_generator: torch Linear stores (out, in); transpose and zero-pad
    # the output dim to H so the matmul directly yields the padded state.
    w_sg = jnp.pad(params["w_sg"].T, ((0, 0), (0, H - A))).astype(jnp.float32)
    b_sg = jnp.pad(params["b_sg"], (0, H - A))[None, :].astype(jnp.float32)
    # message_generator: single (H, E*M) weight, column = e*M + m
    w_msg = params["w_msg"].T.astype(jnp.bfloat16)                # (H, E*M)
    b_msg = params["b_msg"][None, :].astype(jnp.float32)          # (1, E*M)
    # GRU: both gate matmuls fused via a block-diagonal (M+H, 6H) weight so a
    # single MXU push yields [gi | gh] (gate blocks r|z|n in each half).
    w_gru = jnp.zeros((M + H, 6 * H), jnp.float32)
    w_gru = w_gru.at[:M, :3 * H].set(params["w_ih"].T)
    w_gru = w_gru.at[M:, 3 * H:].set(params["w_hh"].T)
    w_gru = w_gru.astype(jnp.bfloat16)                            # (M+H, 6H)
    b_gru = jnp.concatenate([params["b_ih"],
                             params["b_hh"]])[None, :].astype(jnp.float32)

    vmem_inputs = (feat, inv_div, w_sg, b_sg, w_msg, b_msg, w_gru, b_gru)
    inputs = (feat, inv_div, adj, w_sg, b_sg, w_msg, b_msg, w_gru, b_gru)

    kernel = functools.partial(
        ggnn_kernel, n_steps=n_steps, n_edges=E, message_dim=M)

    # ---- VMEM budget with (sublane, 128)-tile rounding ----------------------
    need = (_tile_padded_bytes(adj.shape, adj.dtype)               # single copy
            + 2 * sum(_tile_padded_bytes(x.shape, x.dtype) for x in vmem_inputs)
            + 2 * _tile_padded_bytes((N, H), jnp.float32)          # output
            + (4 << 20))                                           # headroom
    try:
        vmem_cap = int(pltpu.get_tpu_info().vmem_capacity_bytes)
    except Exception:            # conservative default = v7x per-core VMEM
        vmem_cap = 64 << 20
    cap = int(vmem_cap * 0.9)
    if need > cap:
        # TODO(synk): stream the adjacency from HBM (emit_pipeline, K-blocked
        # spmm) for graphs whose adjacency does not fit resident in VMEM.
        raise ValueError(f"GGNN adjacency does not fit in VMEM: "
                         f"need {need} bytes > cap {cap} bytes")
    vmem_limit = int(min(max(need, 16 << 20), cap))

    in_specs = [
        pl.BlockSpec(feat.shape, lambda i: (0, 0)),
        pl.BlockSpec(inv_div.shape, lambda i: (0, 0)),
        pl.BlockSpec(memory_space=pl.ANY),        # adjacency stays in HBM
        pl.BlockSpec(w_sg.shape, lambda i: (0, 0)),
        pl.BlockSpec(b_sg.shape, lambda i: (0, 0)),
        pl.BlockSpec(w_msg.shape, lambda i: (0, 0)),
        pl.BlockSpec(b_msg.shape, lambda i: (0, 0)),
        pl.BlockSpec(w_gru.shape, lambda i: (0, 0)),
        pl.BlockSpec(b_gru.shape, lambda i: (0, 0)),
    ]

    out = pl.pallas_call(
        kernel,
        out_shape=jax.ShapeDtypeStruct((N, H), jnp.float32),
        grid=(1,),
        in_specs=in_specs,
        out_specs=pl.BlockSpec((N, H), lambda i: (0, 0)),
        scratch_shapes=[pltpu.VMEM((E, N, N), jnp.bfloat16),   # manual adj copy
                        pltpu.SemaphoreType.DMA],
        compiler_params=pltpu.CompilerParams(
            dimension_semantics=("arbitrary",),
            vmem_limit_bytes=vmem_limit),
    )(*inputs)
    return out


def ggnn_reference(var_type, node_tokens, mask, adjacency, params, *,
                   n_steps, node_dim, message_dim, annotation_dim,
                   matmul_dtype=jnp.float32):
    """Pure-JAX reference mirroring the PyTorch forward.

    matmul_dtype=bfloat16 reproduces the kernel's precision recipe (bf16 MXU
    operands, f32 accumulation) for a tight numerical cross-check.
    """
    def mm(a, b):
        return jnp.dot(a.astype(matmul_dtype), b.astype(matmul_dtype),
                       preferred_element_type=jnp.float32)

    tok = params["token_table"][node_tokens]
    tokens = jnp.sum(tok * mask[:, :, None], axis=1)
    types = params["type_table"][var_type]
    feat = jnp.concatenate([tokens, types], axis=1)
    ann = feat @ params["w_sg"].T + params["b_sg"]        # state_generator: f32
    state = jnp.pad(ann, ((0, 0), (0, node_dim - annotation_dim)))
    divider = jnp.maximum(jnp.sum(adjacency, axis=1, keepdims=True), 1.0)
    H, M = node_dim, message_dim
    for _ in range(n_steps):
        msg_out = (mm(state, params["w_msg"].T) + params["b_msg"]).reshape(-1, M)
        msg_in = mm(adjacency, msg_out) / divider
        gi = mm(msg_in, params["w_ih"].T) + params["b_ih"]
        gh = mm(state, params["w_hh"].T) + params["b_hh"]
        r = jax.nn.sigmoid(gi[:, :H] + gh[:, :H])
        z = jax.nn.sigmoid(gi[:, H:2 * H] + gh[:, H:2 * H])
        nn_ = jnp.tanh(gi[:, 2 * H:] + r * gh[:, 2 * H:])
        state = (1.0 - z) * nn_ + z * state
    return state


def init_params(key, n_tokens, n_types, n_edges, node_dim, token_dim,
                type_dim, annotation_dim, message_dim):
    ks = jax.random.split(key, 10)
    f = token_dim + type_dim

    def u(k, shape, fan_in):
        bound = 1.0 / float(fan_in) ** 0.5
        return jax.random.uniform(k, shape, jnp.float32, -bound, bound)

    return dict(
        token_table=jax.random.normal(ks[0], (n_tokens, token_dim), jnp.float32),
        type_table=jax.random.normal(ks[1], (n_types, type_dim), jnp.float32),
        w_sg=u(ks[2], (annotation_dim, f), f),
        b_sg=u(ks[3], (annotation_dim,), f),
        w_msg=u(ks[4], (message_dim * n_edges, node_dim), node_dim),
        b_msg=u(ks[5], (message_dim * n_edges,), node_dim),
        w_ih=u(ks[6], (3 * node_dim, message_dim), node_dim),
        b_ih=u(ks[7], (3 * node_dim,), node_dim),
        w_hh=u(ks[8], (3 * node_dim, node_dim), node_dim),
        b_hh=u(ks[9], (3 * node_dim,), node_dim),
    )


if __name__ == "__main__":
    # small synthetic problem
    N, L = 16, 8                       # nodes, tokens-per-node
    n_tokens, n_types, n_edges = 50, 10, 4
    node_dim, token_dim, type_dim = 32, 8, 8
    annotation_dim, message_dim, n_steps = 16, 16, 4

    key = jax.random.PRNGKey(0)
    kp, k1, k2, k3, k4 = jax.random.split(key, 5)
    params = init_params(kp, n_tokens, n_types, n_edges, node_dim,
                         token_dim, type_dim, annotation_dim, message_dim)

    var_type = jax.random.randint(k1, (N,), 0, n_types)
    node_tokens = jax.random.randint(k2, (N, L), 0, n_tokens)
    mask = (jax.random.uniform(k3, (N, L)) > 0.3).astype(jnp.float32)
    # dense stand-in for the sparse adjacency (N, N * n_edges)
    adjacency = (jax.random.uniform(k4, (N, N * n_edges)) > 0.85).astype(jnp.float32)

    out = ggnn_forward(var_type, node_tokens, mask, adjacency, params,
                       n_steps=n_steps, n_edges=n_edges, node_dim=node_dim,
                       message_dim=message_dim, annotation_dim=annotation_dim)
    out = jax.block_until_ready(out)
    assert out.shape == (N, node_dim)

    # Tight check against a reference using the SAME precision recipe
    # (bf16 MXU operands, f32 accumulation): validates the kernel logic.
    ref_match = ggnn_reference(var_type, node_tokens, mask, adjacency, params,
                               n_steps=n_steps, node_dim=node_dim,
                               message_dim=message_dim,
                               annotation_dim=annotation_dim,
                               matmul_dtype=jnp.bfloat16)
    err_match = float(jnp.max(jnp.abs(out - ref_match)))
    assert err_match < 5e-3, f"matched-precision mismatch: max abs err {err_match}"

    # Loose sanity check against the fp32 PyTorch-equivalent math (bf16 MXU
    # operands necessarily deviate slightly from full fp32).
    ref_f32 = ggnn_reference(var_type, node_tokens, mask, adjacency, params,
                             n_steps=n_steps, node_dim=node_dim,
                             message_dim=message_dim,
                             annotation_dim=annotation_dim,
                             matmul_dtype=jnp.float32)
    err_f32 = float(jnp.max(jnp.abs(out - ref_f32)))
    assert err_f32 < 0.25, f"fp32-reference deviation too large: {err_f32}"

    print("KERNEL_OK")
</pallas_src>

<mosaic_0001>
module attributes {stable_mosaic.version = 11 : i64} {
  func.func @ggnn_kernel(%arg0: i32, %arg1: memref<16x16xf32, #tpu.memory_space<vmem>>, %arg2: memref<16x1xf32, #tpu.memory_space<vmem>>, %arg3: memref<4x16x16xbf16, #tpu.memory_space<any>>, %arg4: memref<16x32xf32, #tpu.memory_space<vmem>>, %arg5: memref<1x32xf32, #tpu.memory_space<vmem>>, %arg6: memref<32x64xbf16, #tpu.memory_space<vmem>>, %arg7: memref<1x64xf32, #tpu.memory_space<vmem>>, %arg8: memref<48x192xbf16, #tpu.memory_space<vmem>>, %arg9: memref<1x192xf32, #tpu.memory_space<vmem>>, %arg10: memref<16x32xf32, #tpu.memory_space<vmem>>, %arg11: memref<4x16x16xbf16, #tpu.memory_space<vmem>>, %arg12: memref<!tpu.dma_semaphore, #tpu.memory_space<semaphore_mem>>) attributes {dimension_semantics = [#tpu.dimension_semantics<arbitrary>], iteration_bounds = array<i64: 1>, scalar_prefetch = 0 : i64, scratch_operands = 2 : i64, tpu.core_type = #tpu.core_type<tc>, window_params = [{pipeline_mode = #tpu.pipeline_mode<synchronous>, transform_indices = @transform_0, window_bounds = array<i64: 16, 16>}, {pipeline_mode = #tpu.pipeline_mode<synchronous>, transform_indices = @transform_1, window_bounds = array<i64: 16, 1>}, {}, {pipeline_mode = #tpu.pipeline_mode<synchronous>, transform_indices = @transform_3, window_bounds = array<i64: 16, 32>}, {pipeline_mode = #tpu.pipeline_mode<synchronous>, transform_indices = @transform_4, window_bounds = array<i64: 1, 32>}, {pipeline_mode = #tpu.pipeline_mode<synchronous>, transform_indices = @transform_5, window_bounds = array<i64: 32, 64>}, {pipeline_mode = #tpu.pipeline_mode<synchronous>, transform_indices = @transform_6, window_bounds = array<i64: 1, 64>}, {pipeline_mode = #tpu.pipeline_mode<synchronous>, transform_indices = @transform_7, window_bounds = array<i64: 48, 192>}, {pipeline_mode = #tpu.pipeline_mode<synchronous>, transform_indices = @transform_8, window_bounds = array<i64: 1, 192>}, {pipeline_mode = #tpu.pipeline_mode<synchronous>, transform_indices = @transform_9, window_bounds = array<i64: 16, 32>}]} {
    tpu.enqueue_dma source(%arg3 : memref<4x16x16xbf16, #tpu.memory_space<any>>) target(%arg11 : memref<4x16x16xbf16, #tpu.memory_space<vmem>>) target_semaphore(%arg12 : memref<!tpu.dma_semaphore, #tpu.memory_space<semaphore_mem>>)
    %c0 = arith.constant 0 : index
    %c0_0 = arith.constant 0 : index
    %0 = vector.load %arg1[%c0, %c0_0] : memref<16x16xf32, #tpu.memory_space<vmem>>, vector<16x16xf32>
    %c0_1 = arith.constant 0 : index
    %c0_2 = arith.constant 0 : index
    %1 = vector.load %arg4[%c0_1, %c0_2] : memref<16x32xf32, #tpu.memory_space<vmem>>, vector<16x32xf32>
    %cst = arith.constant dense<0.000000e+00> : vector<16x32xf32>
    %2 = tpu.matmul %0, %1, %cst {dimension_numbers = #tpu.dot_dimension_numbers<[1], [0], [0], [1], [0, 0, 1, 1], [], []>} : vector<16x16xf32>, vector<16x32xf32>, vector<16x32xf32> -> vector<16x32xf32>
    %c0_3 = arith.constant 0 : index
    %c0_4 = arith.constant 0 : index
    %3 = vector.load %arg5[%c0_3, %c0_4] : memref<1x32xf32, #tpu.memory_space<vmem>>, vector<1x32xf32>
    %4 = vector.broadcast %3 : vector<1x32xf32> to vector<16x32xf32>
    %5 = arith.addf %2, %4 : vector<16x32xf32>
    %c0_5 = arith.constant 0 : index
    %c0_6 = arith.constant 0 : index
    %6 = vector.load %arg2[%c0_5, %c0_6] : memref<16x1xf32, #tpu.memory_space<vmem>>, vector<16x1xf32>
    %c0_7 = arith.constant 0 : index
    %c0_8 = arith.constant 0 : index
    %7 = vector.load %arg7[%c0_7, %c0_8] : memref<1x64xf32, #tpu.memory_space<vmem>>, vector<1x64xf32>
    %c0_9 = arith.constant 0 : index
    %c0_10 = arith.constant 0 : index
    %8 = vector.load %arg9[%c0_9, %c0_10] : memref<1x192xf32, #tpu.memory_space<vmem>>, vector<1x192xf32>
    %9 = arith.truncf %5 : vector<16x32xf32> to vector<16x32xbf16>
    %c0_11 = arith.constant 0 : index
    %c0_12 = arith.constant 0 : index
    %10 = vector.load %arg6[%c0_11, %c0_12] : memref<32x64xbf16, #tpu.memory_space<vmem>>, vector<32x64xbf16>
    %cst_13 = arith.constant dense<0.000000e+00> : vector<16x64xf32>
    %11 = tpu.matmul %9, %10, %cst_13 {dimension_numbers = #tpu.dot_dimension_numbers<[1], [0], [0], [1], [0, 0, 1, 1], [], []>} : vector<16x32xbf16>, vector<32x64xbf16>, vector<16x64xf32> -> vector<16x64xf32>
    %12 = vector.broadcast %7 : vector<1x64xf32> to vector<16x64xf32>
    %13 = arith.addf %11, %12 : vector<16x64xf32>
    %14 = arith.truncf %13 : vector<16x64xf32> to vector<16x64xbf16>
    tpu.wait_dma2 semaphore(%arg12 : memref<!tpu.dma_semaphore, #tpu.memory_space<semaphore_mem>>) src(%arg3 : memref<4x16x16xbf16, #tpu.memory_space<any>>) dst(%arg11 : memref<4x16x16xbf16, #tpu.memory_space<vmem>>)
    %c0_14 = arith.constant 0 : index
    %c0_15 = arith.constant 0 : index
    %c0_16 = arith.constant 0 : index
    %15 = vector.load %arg11[%c0_14, %c0_15, %c0_16] : memref<4x16x16xbf16, #tpu.memory_space<vmem>>, vector<1x16x16xbf16>
    %16 = vector.shape_cast %15 : vector<1x16x16xbf16> to vector<16x16xbf16>
    %17 = vector.extract_strided_slice %14 {offsets = [0, 0], sizes = [16, 16], strides = [1, 1]} : vector<16x64xbf16> to vector<16x16xbf16>
    %cst_17 = arith.constant dense<0.000000e+00> : vector<16x16xf32>
    %18 = tpu.matmul %16, %17, %cst_17 {dimension_numbers = #tpu.dot_dimension_numbers<[1], [0], [0], [1], [0, 0, 1, 1], [], []>} : vector<16x16xbf16>, vector<16x16xbf16>, vector<16x16xf32> -> vector<16x16xf32>
    %c1 = arith.constant 1 : index
    %c0_18 = arith.constant 0 : index
    %c0_19 = arith.constant 0 : index
    %19 = vector.load %arg11[%c1, %c0_18, %c0_19] : memref<4x16x16xbf16, #tpu.memory_space<vmem>>, vector<1x16x16xbf16>
    %20 = vector.shape_cast %19 : vector<1x16x16xbf16> to vector<16x16xbf16>
    %21 = vector.extract_strided_slice %14 {offsets = [0, 16], sizes = [16, 16], strides = [1, 1]} : vector<16x64xbf16> to vector<16x16xbf16>
    %cst_20 = arith.constant dense<0.000000e+00> : vector<16x16xf32>
    %22 = tpu.matmul %20, %21, %cst_20 {dimension_numbers = #tpu.dot_dimension_numbers<[1], [0], [0], [1], [0, 0, 1, 1], [], []>} : vector<16x16xbf16>, vector<16x16xbf16>, vector<16x16xf32> -> vector<16x16xf32>
    %23 = arith.addf %18, %22 : vector<16x16xf32>
    %c2 = arith.constant 2 : index
    %c0_21 = arith.constant 0 : index
    %c0_22 = arith.constant 0 : index
    %24 = vector.load %arg11[%c2, %c0_21, %c0_22] : memref<4x16x16xbf16, #tpu.memory_space<vmem>>, vector<1x16x16xbf16>
    %25 = vector.shape_cast %24 : vector<1x16x16xbf16> to vector<16x16xbf16>
    %26 = vector.extract_strided_slice %14 {offsets = [0, 32], sizes = [16, 16], strides = [1, 1]} : vector<16x64xbf16> to vector<16x16xbf16>
    %cst_23 = arith.constant dense<0.000000e+00> : vector<16x16xf32>
    %27 = tpu.matmul %25, %26, %cst_23 {dimension_numbers = #tpu.dot_dimension_numbers<[1], [0], [0], [1], [0, 0, 1, 1], [], []>} : vector<16x16xbf16>, vector<16x16xbf16>, vector<16x16xf32> -> vector<16x16xf32>
    %28 = arith.addf %23, %27 : vector<16x16xf32>
    %c3 = arith.constant 3 : index
    %c0_24 = arith.constant 0 : index
    %c0_25 = arith.constant 0 : index
    %29 = vector.load %arg11[%c3, %c0_24, %c0_25] : memref<4x16x16xbf16, #tpu.memory_space<vmem>>, vector<1x16x16xbf16>
    %30 = vector.shape_cast %29 : vector<1x16x16xbf16> to vector<16x16xbf16>
    %31 = vector.extract_strided_slice %14 {offsets = [0, 48], sizes = [16, 16], strides = [1, 1]} : vector<16x64xbf16> to vector<16x16xbf16>
    %cst_26 = arith.constant dense<0.000000e+00> : vector<16x16xf32>
    %32 = tpu.matmul %30, %31, %cst_26 {dimension_numbers = #tpu.dot_dimension_numbers<[1], [0], [0], [1], [0, 0, 1, 1], [], []>} : vector<16x16xbf16>, vector<16x16xbf16>, vector<16x16xf32> -> vector<16x16xf32>
    %33 = arith.addf %28, %32 : vector<16x16xf32>
    %34 = vector.broadcast %6 : vector<16x1xf32> to vector<16x16xf32>
    %35 = arith.mulf %33, %34 : vector<16x16xf32>
    %36 = tpu.concatenate %35, %5 in 1 : vector<16x16xf32>, vector<16x32xf32> -> vector<16x48xf32>
    %37 = arith.truncf %36 : vector<16x48xf32> to vector<16x48xbf16>
    %c0_27 = arith.constant 0 : index
    %c0_28 = arith.constant 0 : index
    %38 = vector.load %arg8[%c0_27, %c0_28] : memref<48x192xbf16, #tpu.memory_space<vmem>>, vector<48x192xbf16>
    %cst_29 = arith.constant dense<0.000000e+00> : vector<16x192xf32>
    %39 = tpu.matmul %37, %38, %cst_29 {dimension_numbers = #tpu.dot_dimension_numbers<[1], [0], [0], [1], [0, 0, 1, 1], [], []>} : vector<16x48xbf16>, vector<48x192xbf16>, vector<16x192xf32> -> vector<16x192xf32>
    %40 = vector.broadcast %8 : vector<1x192xf32> to vector<16x192xf32>
    %41 = arith.addf %39, %40 : vector<16x192xf32>
    %42 = vector.extract_strided_slice %41 {offsets = [0, 0], sizes = [16, 32], strides = [1, 1]} : vector<16x192xf32> to vector<16x32xf32>
    %43 = vector.extract_strided_slice %41 {offsets = [0, 96], sizes = [16, 32], strides = [1, 1]} : vector<16x192xf32> to vector<16x32xf32>
    %44 = arith.addf %42, %43 : vector<16x32xf32>
    %45 = arith.negf %44 : vector<16x32xf32>
    %46 = math.exp %45 : vector<16x32xf32>
    %cst_30 = arith.constant 1.000000e+00 : f32
    %47 = vector.broadcast %cst_30 : f32 to vector<16x32xf32>
    %48 = arith.addf %47, %46 : vector<16x32xf32>
    %49 = arith.divf %47, %48 : vector<16x32xf32>
    %50 = vector.extract_strided_slice %41 {offsets = [0, 32], sizes = [16, 32], strides = [1, 1]} : vector<16x192xf32> to vector<16x32xf32>
    %51 = vector.extract_strided_slice %41 {offsets = [0, 128], sizes = [16, 32], strides = [1, 1]} : vector<16x192xf32> to vector<16x32xf32>
    %52 = arith.addf %50, %51 : vector<16x32xf32>
    %53 = arith.negf %52 : vector<16x32xf32>
    %54 = math.exp %53 : vector<16x32xf32>
    %cst_31 = arith.constant 1.000000e+00 : f32
    %55 = vector.broadcast %cst_31 : f32 to vector<16x32xf32>
    %56 = arith.addf %55, %54 : vector<16x32xf32>
    %57 = arith.divf %55, %56 : vector<16x32xf32>
    %58 = vector.extract_strided_slice %41 {offsets = [0, 64], sizes = [16, 32], strides = [1, 1]} : vector<16x192xf32> to vector<16x32xf32>
    %59 = vector.extract_strided_slice %41 {offsets = [0, 160], sizes = [16, 32], strides = [1, 1]} : vector<16x192xf32> to vector<16x32xf32>
    %60 = arith.mulf %49, %59 : vector<16x32xf32>
    %61 = arith.addf %58, %60 : vector<16x32xf32>
    %62 = math.tanh %61 : vector<16x32xf32>
    %cst_32 = arith.constant 1.000000e+00 : f32
    %63 = vector.broadcast %cst_32 : f32 to vector<16x32xf32>
    %64 = arith.subf %63, %57 : vector<16x32xf32>
    %65 = arith.mulf %64, %62 : vector<16x32xf32>
    %66 = arith.mulf %57, %5 : vector<16x32xf32>
    %67 = arith.addf %65, %66 : vector<16x32xf32>
    %68 = arith.truncf %67 : vector<16x32xf32> to vector<16x32xbf16>
    %c0_33 = arith.constant 0 : index
    %c0_34 = arith.constant 0 : index
    %69 = vector.load %arg6[%c0_33, %c0_34] : memref<32x64xbf16, #tpu.memory_space<vmem>>, vector<32x64xbf16>
    %cst_35 = arith.constant dense<0.000000e+00> : vector<16x64xf32>
    %70 = tpu.matmul %68, %69, %cst_35 {dimension_numbers = #tpu.dot_dimension_numbers<[1], [0], [0], [1], [0, 0, 1, 1], [], []>} : vector<16x32xbf16>, vector<32x64xbf16>, vector<16x64xf32> -> vector<16x64xf32>
    %71 = vector.broadcast %7 : vector<1x64xf32> to vector<16x64xf32>
    %72 = arith.addf %70, %71 : vector<16x64xf32>
    %73 = arith.truncf %72 : vector<16x64xf32> to vector<16x64xbf16>
    %c0_36 = arith.constant 0 : index
    %c0_37 = arith.constant 0 : index
    %c0_38 = arith.constant 0 : index
    %74 = vector.load %arg11[%c0_36, %c0_37, %c0_38] : memref<4x16x16xbf16, #tpu.memory_space<vmem>>, vector<1x16x16xbf16>
    %75 = vector.shape_cast %74 : vector<1x16x16xbf16> to vector<16x16xbf16>
    %76 = vector.extract_strided_slice %73 {offsets = [0, 0], sizes = [16, 16], strides = [1, 1]} : vector<16x64xbf16> to vector<16x16xbf16>
    %cst_39 = arith.constant dense<0.000000e+00> : vector<16x16xf32>
    %77 = tpu.matmul %75, %76, %cst_39 {dimension_numbers = #tpu.dot_dimension_numbers<[1], [0], [0], [1], [0, 0, 1, 1], [], []>} : vector<16x16xbf16>, vector<16x16xbf16>, vector<16x16xf32> -> vector<16x16xf32>
    %c1_40 = arith.constant 1 : index
    %c0_41 = arith.constant 0 : index
    %c0_42 = arith.constant 0 : index
    %78 = vector.load %arg11[%c1_40, %c0_41, %c0_42] : memref<4x16x16xbf16, #tpu.memory_space<vmem>>, vector<1x16x16xbf16>
    %79 = vector.shape_cast %78 : vector<1x16x16xbf16> to vector<16x16xbf16>
    %80 = vector.extract_strided_slice %73 {offsets = [0, 16], sizes = [16, 16], strides = [1, 1]} : vector<16x64xbf16> to vector<16x16xbf16>
    %cst_43 = arith.constant dense<0.000000e+00> : vector<16x16xf32>
    %81 = tpu.matmul %79, %80, %cst_43 {dimension_numbers = #tpu.dot_dimension_numbers<[1], [0], [0], [1], [0, 0, 1, 1], [], []>} : vector<16x16xbf16>, vector<16x16xbf16>, vector<16x16xf32> -> vector<16x16xf32>
    %82 = arith.addf %77, %81 : vector<16x16xf32>
    %c2_44 = arith.constant 2 : index
    %c0_45 = arith.constant 0 : index
    %c0_46 = arith.constant 0 : index
    %83 = vector.load %arg11[%c2_44, %c0_45, %c0_46] : memref<4x16x16xbf16, #tpu.memory_space<vmem>>, vector<1x16x16xbf16>
    %84 = vector.shape_cast %83 : vector<1x16x16xbf16> to vector<16x16xbf16>
    %85 = vector.extract_strided_slice %73 {offsets = [0, 32], sizes = [16, 16], strides = [1, 1]} : vector<16x64xbf16> to vector<16x16xbf16>
    %cst_47 = arith.constant dense<0.000000e+00> : vector<16x16xf32>
    %86 = tpu.matmul %84, %85, %cst_47 {dimension_numbers = #tpu.dot_dimension_numbers<[1], [0], [0], [1], [0, 0, 1, 1], [], []>} : vector<16x16xbf16>, vector<16x16xbf16>, vector<16x16xf32> -> vector<16x16xf32>
    %87 = arith.addf %82, %86 : vector<16x16xf32>
    %c3_48 = arith.constant 3 : index
    %c0_49 = arith.constant 0 : index
    %c0_50 = arith.constant 0 : index
    %88 = vector.load %arg11[%c3_48, %c0_49, %c0_50] : memref<4x16x16xbf16, #tpu.memory_space<vmem>>, vector<1x16x16xbf16>
    %89 = vector.shape_cast %88 : vector<1x16x16xbf16> to vector<16x16xbf16>
    %90 = vector.extract_strided_slice %73 {offsets = [0, 48], sizes = [16, 16], strides = [1, 1]} : vector<16x64xbf16> to vector<16x16xbf16>
    %cst_51 = arith.constant dense<0.000000e+00> : vector<16x16xf32>
    %91 = tpu.matmul %89, %90, %cst_51 {dimension_numbers = #tpu.dot_dimension_numbers<[1], [0], [0], [1], [0, 0, 1, 1], [], []>} : vector<16x16xbf16>, vector<16x16xbf16>, vector<16x16xf32> -> vector<16x16xf32>
    %92 = arith.addf %87, %91 : vector<16x16xf32>
    %93 = vector.broadcast %6 : vector<16x1xf32> to vector<16x16xf32>
    %94 = arith.mulf %92, %93 : vector<16x16xf32>
    %95 = tpu.concatenate %94, %67 in 1 : vector<16x16xf32>, vector<16x32xf32> -> vector<16x48xf32>
    %96 = arith.truncf %95 : vector<16x48xf32> to vector<16x48xbf16>
    %c0_52 = arith.constant 0 : index
    %c0_53 = arith.constant 0 : index
    %97 = vector.load %arg8[%c0_52, %c0_53] : memref<48x192xbf16, #tpu.memory_space<vmem>>, vector<48x192xbf16>
    %cst_54 = arith.constant dense<0.000000e+00> : vector<16x192xf32>
    %98 = tpu.matmul %96, %97, %cst_54 {dimension_numbers = #tpu.dot_dimension_numbers<[1], [0], [0], [1], [0, 0, 1, 1], [], []>} : vector<16x48xbf16>, vector<48x192xbf16>, vector<16x192xf32> -> vector<16x192xf32>
    %99 = vector.broadcast %8 : vector<1x192xf32> to vector<16x192xf32>
    %100 = arith.addf %98, %99 : vector<16x192xf32>
    %101 = vector.extract_strided_slice %100 {offsets = [0, 0], sizes = [16, 32], strides = [1, 1]} : vector<16x192xf32> to vector<16x32xf32>
    %102 = vector.extract_strided_slice %100 {offsets = [0, 96], sizes = [16, 32], strides = [1, 1]} : vector<16x192xf32> to vector<16x32xf32>
    %103 = arith.addf %101, %102 : vector<16x32xf32>
    %104 = arith.negf %103 : vector<16x32xf32>
    %105 = math.exp %104 : vector<16x32xf32>
    %cst_55 = arith.constant 1.000000e+00 : f32
    %106 = vector.broadcast %cst_55 : f32 to vector<16x32xf32>
    %107 = arith.addf %106, %105 : vector<16x32xf32>
    %108 = arith.divf %106, %107 : vector<16x32xf32>
    %109 = vector.extract_strided_slice %100 {offsets = [0, 32], sizes = [16, 32], strides = [1, 1]} : vector<16x192xf32> to vector<16x32xf32>
    %110 = vector.extract_strided_slice %100 {offsets = [0, 128], sizes = [16, 32], strides = [1, 1]} : vector<16x192xf32> to vector<16x32xf32>
    %111 = arith.addf %109, %110 : vector<16x32xf32>
    %112 = arith.negf %111 : vector<16x32xf32>
    %113 = math.exp %112 : vector<16x32xf32>
    %cst_56 = arith.constant 1.000000e+00 : f32
    %114 = vector.broadcast %cst_56 : f32 to vector<16x32xf32>
    %115 = arith.addf %114, %113 : vector<16x32xf32>
    %116 = arith.divf %114, %115 : vector<16x32xf32>
    %117 = vector.extract_strided_slice %100 {offsets = [0, 64], sizes = [16, 32], strides = [1, 1]} : vector<16x192xf32> to vector<16x32xf32>
    %118 = vector.extract_strided_slice %100 {offsets = [0, 160], sizes = [16, 32], strides = [1, 1]} : vector<16x192xf32> to vector<16x32xf32>
    %119 = arith.mulf %108, %118 : vector<16x32xf32>
    %120 = arith.addf %117, %119 : vector<16x32xf32>
    %121 = math.tanh %120 : vector<16x32xf32>
    %cst_57 = arith.constant 1.000000e+00 : f32
    %122 = vector.broadcast %cst_57 : f32 to vector<16x32xf32>
    %123 = arith.subf %122, %116 : vector<16x32xf32>
    %124 = arith.mulf %123, %121 : vector<16x32xf32>
    %125 = arith.mulf %116, %67 : vector<16x32xf32>
    %126 = arith.addf %124, %125 : vector<16x32xf32>
    %127 = arith.truncf %126 : vector<16x32xf32> to vector<16x32xbf16>
    %c0_58 = arith.constant 0 : index
    %c0_59 = arith.constant 0 : index
    %128 = vector.load %arg6[%c0_58, %c0_59] : memref<32x64xbf16, #tpu.memory_space<vmem>>, vector<32x64xbf16>
    %cst_60 = arith.constant dense<0.000000e+00> : vector<16x64xf32>
    %129 = tpu.matmul %127, %128, %cst_60 {dimension_numbers = #tpu.dot_dimension_numbers<[1], [0], [0], [1], [0, 0, 1, 1], [], []>} : vector<16x32xbf16>, vector<32x64xbf16>, vector<16x64xf32> -> vector<16x64xf32>
    %130 = vector.broadcast %7 : vector<1x64xf32> to vector<16x64xf32>
    %131 = arith.addf %129, %130 : vector<16x64xf32>
    %132 = arith.truncf %131 : vector<16x64xf32> to vector<16x64xbf16>
    %c0_61 = arith.constant 0 : index
    %c0_62 = arith.constant 0 : index
    %c0_63 = arith.constant 0 : index
    %133 = vector.load %arg11[%c0_61, %c0_62, %c0_63] : memref<4x16x16xbf16, #tpu.memory_space<vmem>>, vector<1x16x16xbf16>
    %134 = vector.shape_cast %133 : vector<1x16x16xbf16> to vector<16x16xbf16>
    %135 = vector.extract_strided_slice %132 {offsets = [0, 0], sizes = [16, 16], strides = [1, 1]} : vector<16x64xbf16> to vector<16x16xbf16>
    %cst_64 = arith.constant dense<0.000000e+00> : vector<16x16xf32>
    %136 = tpu.matmul %134, %135, %cst_64 {dimension_numbers = #tpu.dot_dimension_numbers<[1], [0], [0], [1], [0, 0, 1, 1], [], []>} : vector<16x16xbf16>, vector<16x16xbf16>, vector<16x16xf32> -> vector<16x16xf32>
    %c1_65 = arith.constant 1 : index
    %c0_66 = arith.constant 0 : index
    %c0_67 = arith.constant 0 : index
    %137 = vector.load %arg11[%c1_65, %c0_66, %c0_67] : memref<4x16x16xbf16, #tpu.memory_space<vmem>>, vector<1x16x16xbf16>
    %138 = vector.shape_cast %137 : vector<1x16x16xbf16> to vector<16x16xbf16>
    %139 = vector.extract_strided_slice %132 {offsets = [0, 16], sizes = [16, 16], strides = [1, 1]} : vector<16x64xbf16> to vector<16x16xbf16>
    %cst_68 = arith.constant dense<0.000000e+00> : vector<16x16xf32>
    %140 = tpu.matmul %138, %139, %cst_68 {dimension_numbers = #tpu.dot_dimension_numbers<[1], [0], [0], [1], [0, 0, 1, 1], [], []>} : vector<16x16xbf16>, vector<16x16xbf16>, vector<16x16xf32> -> vector<16x16xf32>
    %141 = arith.addf %136, %140 : vector<16x16xf32>
    %c2_69 = arith.constant 2 : index
    %c0_70 = arith.constant 0 : index
    %c0_71 = arith.constant 0 : index
    %142 = vector.load %arg11[%c2_69, %c0_70, %c0_71] : memref<4x16x16xbf16, #tpu.memory_space<vmem>>, vector<1x16x16xbf16>
    %143 = vector.shape_cast %142 : vector<1x16x16xbf16> to vector<16x16xbf16>
    %144 = vector.extract_strided_slice %132 {offsets = [0, 32], sizes = [16, 16], strides = [1, 1]} : vector<16x64xbf16> to vector<16x16xbf16>
    %cst_72 = arith.constant dense<0.000000e+00> : vector<16x16xf32>
    %145 = tpu.matmul %143, %144, %cst_72 {dimension_numbers = #tpu.dot_dimension_numbers<[1], [0], [0], [1], [0, 0, 1, 1], [], []>} : vector<16x16xbf16>, vector<16x16xbf16>, vector<16x16xf32> -> vector<16x16xf32>
    %146 = arith.addf %141, %145 : vector<16x16xf32>
    %c3_73 = arith.constant 3 : index
    %c0_74 = arith.constant 0 : index
    %c0_75 = arith.constant 0 : index
    %147 = vector.load %arg11[%c3_73, %c0_74, %c0_75] : memref<4x16x16xbf16, #tpu.memory_space<vmem>>, vector<1x16x16xbf16>
    %148 = vector.shape_cast %147 : vector<1x16x16xbf16> to vector<16x16xbf16>
    %149 = vector.extract_strided_slice %132 {offsets = [0, 48], sizes = [16, 16], strides = [1, 1]} : vector<16x64xbf16> to vector<16x16xbf16>
    %cst_76 = arith.constant dense<0.000000e+00> : vector<16x16xf32>
    %150 = tpu.matmul %148, %149, %cst_76 {dimension_numbers = #tpu.dot_dimension_numbers<[1], [0], [0], [1], [0, 0, 1, 1], [], []>} : vector<16x16xbf16>, vector<16x16xbf16>, vector<16x16xf32> -> vector<16x16xf32>
    %151 = arith.addf %146, %150 : vector<16x16xf32>
    %152 = vector.broadcast %6 : vector<16x1xf32> to vector<16x16xf32>
    %153 = arith.mulf %151, %152 : vector<16x16xf32>
    %154 = tpu.concatenate %153, %126 in 1 : vector<16x16xf32>, vector<16x32xf32> -> vector<16x48xf32>
    %155 = arith.truncf %154 : vector<16x48xf32> to vector<16x48xbf16>
    %c0_77 = arith.constant 0 : index
    %c0_78 = arith.constant 0 : index
    %156 = vector.load %arg8[%c0_77, %c0_78] : memref<48x192xbf16, #tpu.memory_space<vmem>>, vector<48x192xbf16>
    %cst_79 = arith.constant dense<0.000000e+00> : vector<16x192xf32>
    %157 = tpu.matmul %155, %156, %cst_79 {dimension_numbers = #tpu.dot_dimension_numbers<[1], [0], [0], [1], [0, 0, 1, 1], [], []>} : vector<16x48xbf16>, vector<48x192xbf16>, vector<16x192xf32> -> vector<16x192xf32>
    %158 = vector.broadcast %8 : vector<1x192xf32> to vector<16x192xf32>
    %159 = arith.addf %157, %158 : vector<16x192xf32>
    %160 = vector.extract_strided_slice %159 {offsets = [0, 0], sizes = [16, 32], strides = [1, 1]} : vector<16x192xf32> to vector<16x32xf32>
    %161 = vector.extract_strided_slice %159 {offsets = [0, 96], sizes = [16, 32], strides = [1, 1]} : vector<16x192xf32> to vector<16x32xf32>
    %162 = arith.addf %160, %161 : vector<16x32xf32>
    %163 = arith.negf %162 : vector<16x32xf32>
    %164 = math.exp %163 : vector<16x32xf32>
    %cst_80 = arith.constant 1.000000e+00 : f32
    %165 = vector.broadcast %cst_80 : f32 to vector<16x32xf32>
    %166 = arith.addf %165, %164 : vector<16x32xf32>
    %167 = arith.divf %165, %166 : vector<16x32xf32>
    %168 = vector.extract_strided_slice %159 {offsets = [0, 32], sizes = [16, 32], strides = [1, 1]} : vector<16x192xf32> to vector<16x32xf32>
    %169 = vector.extract_strided_slice %159 {offsets = [0, 128], sizes = [16, 32], strides = [1, 1]} : vector<16x192xf32> to vector<16x32xf32>
    %170 = arith.addf %168, %169 : vector<16x32xf32>
    %171 = arith.negf %170 : vector<16x32xf32>
    %172 = math.exp %171 : vector<16x32xf32>
    %cst_81 = arith.constant 1.000000e+00 : f32
    %173 = vector.broadcast %cst_81 : f32 to vector<16x32xf32>
    %174 = arith.addf %173, %172 : vector<16x32xf32>
    %175 = arith.divf %173, %174 : vector<16x32xf32>
    %176 = vector.extract_strided_slice %159 {offsets = [0, 64], sizes = [16, 32], strides = [1, 1]} : vector<16x192xf32> to vector<16x32xf32>
    %177 = vector.extract_strided_slice %159 {offsets = [0, 160], sizes = [16, 32], strides = [1, 1]} : vector<16x192xf32> to vector<16x32xf32>
    %178 = arith.mulf %167, %177 : vector<16x32xf32>
    %179 = arith.addf %176, %178 : vector<16x32xf32>
    %180 = math.tanh %179 : vector<16x32xf32>
    %cst_82 = arith.constant 1.000000e+00 : f32
    %181 = vector.broadcast %cst_82 : f32 to vector<16x32xf32>
    %182 = arith.subf %181, %175 : vector<16x32xf32>
    %183 = arith.mulf %182, %180 : vector<16x32xf32>
    %184 = arith.mulf %175, %126 : vector<16x32xf32>
    %185 = arith.addf %183, %184 : vector<16x32xf32>
    %186 = arith.truncf %185 : vector<16x32xf32> to vector<16x32xbf16>
    %c0_83 = arith.constant 0 : index
    %c0_84 = arith.constant 0 : index
    %187 = vector.load %arg6[%c0_83, %c0_84] : memref<32x64xbf16, #tpu.memory_space<vmem>>, vector<32x64xbf16>
    %cst_85 = arith.constant dense<0.000000e+00> : vector<16x64xf32>
    %188 = tpu.matmul %186, %187, %cst_85 {dimension_numbers = #tpu.dot_dimension_numbers<[1], [0], [0], [1], [0, 0, 1, 1], [], []>} : vector<16x32xbf16>, vector<32x64xbf16>, vector<16x64xf32> -> vector<16x64xf32>
    %189 = vector.broadcast %7 : vector<1x64xf32> to vector<16x64xf32>
    %190 = arith.addf %188, %189 : vector<16x64xf32>
    %191 = arith.truncf %190 : vector<16x64xf32> to vector<16x64xbf16>
    %c0_86 = arith.constant 0 : index
    %c0_87 = arith.constant 0 : index
    %c0_88 = arith.constant 0 : index
    %192 = vector.load %arg11[%c0_86, %c0_87, %c0_88] : memref<4x16x16xbf16, #tpu.memory_space<vmem>>, vector<1x16x16xbf16>
    %193 = vector.shape_cast %192 : vector<1x16x16xbf16> to vector<16x16xbf16>
    %194 = vector.extract_strided_slice %191 {offsets = [0, 0], sizes = [16, 16], strides = [1, 1]} : vector<16x64xbf16> to vector<16x16xbf16>
    %cst_89 = arith.constant dense<0.000000e+00> : vector<16x16xf32>
    %195 = tpu.matmul %193, %194, %cst_89 {dimension_numbers = #tpu.dot_dimension_numbers<[1], [0], [0], [1], [0, 0, 1, 1], [], []>} : vector<16x16xbf16>, vector<16x16xbf16>, vector<16x16xf32> -> vector<16x16xf32>
    %c1_90 = arith.constant 1 : index
    %c0_91 = arith.constant 0 : index
    %c0_92 = arith.constant 0 : index
    %196 = vector.load %arg11[%c1_90, %c0_91, %c0_92] : memref<4x16x16xbf16, #tpu.memory_space<vmem>>, vector<1x16x16xbf16>
    %197 = vector.shape_cast %196 : vector<1x16x16xbf16> to vector<16x16xbf16>
    %198 = vector.extract_strided_slice %191 {offsets = [0, 16], sizes = [16, 16], strides = [1, 1]} : vector<16x64xbf16> to vector<16x16xbf16>
    %cst_93 = arith.constant dense<0.000000e+00> : vector<16x16xf32>
    %199 = tpu.matmul %197, %198, %cst_93 {dimension_numbers = #tpu.dot_dimension_numbers<[1], [0], [0], [1], [0, 0, 1, 1], [], []>} : vector<16x16xbf16>, vector<16x16xbf16>, vector<16x16xf32> -> vector<16x16xf32>
    %200 = arith.addf %195, %199 : vector<16x16xf32>
    %c2_94 = arith.constant 2 : index
    %c0_95 = arith.constant 0 : index
    %c0_96 = arith.constant 0 : index
    %201 = vector.load %arg11[%c2_94, %c0_95, %c0_96] : memref<4x16x16xbf16, #tpu.memory_space<vmem>>, vector<1x16x16xbf16>
    %202 = vector.shape_cast %201 : vector<1x16x16xbf16> to vector<16x16xbf16>
    %203 = vector.extract_strided_slice %191 {offsets = [0, 32], sizes = [16, 16], strides = [1, 1]} : vector<16x64xbf16> to vector<16x16xbf16>
    %cst_97 = arith.constant dense<0.000000e+00> : vector<16x16xf32>
    %204 = tpu.matmul %202, %203, %cst_97 {dimension_numbers = #tpu.dot_dimension_numbers<[1], [0], [0], [1], [0, 0, 1, 1], [], []>} : vector<16x16xbf16>, vector<16x16xbf16>, vector<16x16xf32> -> vector<16x16xf32>
    %205 = arith.addf %200, %204 : vector<16x16xf32>
    %c3_98 = arith.constant 3 : index
    %c0_99 = arith.constant 0 : index
    %c0_100 = arith.constant 0 : index
    %206 = vector.load %arg11[%c3_98, %c0_99, %c0_100] : memref<4x16x16xbf16, #tpu.memory_space<vmem>>, vector<1x16x16xbf16>
    %207 = vector.shape_cast %206 : vector<1x16x16xbf16> to vector<16x16xbf16>
    %208 = vector.extract_strided_slice %191 {offsets = [0, 48], sizes = [16, 16], strides = [1, 1]} : vector<16x64xbf16> to vector<16x16xbf16>
    %cst_101 = arith.constant dense<0.000000e+00> : vector<16x16xf32>
    %209 = tpu.matmul %207, %208, %cst_101 {dimension_numbers = #tpu.dot_dimension_numbers<[1], [0], [0], [1], [0, 0, 1, 1], [], []>} : vector<16x16xbf16>, vector<16x16xbf16>, vector<16x16xf32> -> vector<16x16xf32>
    %210 = arith.addf %205, %209 : vector<16x16xf32>
    %211 = vector.broadcast %6 : vector<16x1xf32> to vector<16x16xf32>
    %212 = arith.mulf %210, %211 : vector<16x16xf32>
    %213 = tpu.concatenate %212, %185 in 1 : vector<16x16xf32>, vector<16x32xf32> -> vector<16x48xf32>
    %214 = arith.truncf %213 : vector<16x48xf32> to vector<16x48xbf16>
    %c0_102 = arith.constant 0 : index
    %c0_103 = arith.constant 0 : index
    %215 = vector.load %arg8[%c0_102, %c0_103] : memref<48x192xbf16, #tpu.memory_space<vmem>>, vector<48x192xbf16>
    %cst_104 = arith.constant dense<0.000000e+00> : vector<16x192xf32>
    %216 = tpu.matmul %214, %215, %cst_104 {dimension_numbers = #tpu.dot_dimension_numbers<[1], [0], [0], [1], [0, 0, 1, 1], [], []>} : vector<16x48xbf16>, vector<48x192xbf16>, vector<16x192xf32> -> vector<16x192xf32>
    %217 = vector.broadcast %8 : vector<1x192xf32> to vector<16x192xf32>
    %218 = arith.addf %216, %217 : vector<16x192xf32>
    %219 = vector.extract_strided_slice %218 {offsets = [0, 0], sizes = [16, 32], strides = [1, 1]} : vector<16x192xf32> to vector<16x32xf32>
    %220 = vector.extract_strided_slice %218 {offsets = [0, 96], sizes = [16, 32], strides = [1, 1]} : vector<16x192xf32> to vector<16x32xf32>
    %221 = arith.addf %219, %220 : vector<16x32xf32>
    %222 = arith.negf %221 : vector<16x32xf32>
    %223 = math.exp %222 : vector<16x32xf32>
    %cst_105 = arith.constant 1.000000e+00 : f32
    %224 = vector.broadcast %cst_105 : f32 to vector<16x32xf32>
    %225 = arith.addf %224, %223 : vector<16x32xf32>
    %226 = arith.divf %224, %225 : vector<16x32xf32>
    %227 = vector.extract_strided_slice %218 {offsets = [0, 32], sizes = [16, 32], strides = [1, 1]} : vector<16x192xf32> to vector<16x32xf32>
    %228 = vector.extract_strided_slice %218 {offsets = [0, 128], sizes = [16, 32], strides = [1, 1]} : vector<16x192xf32> to vector<16x32xf32>
    %229 = arith.addf %227, %228 : vector<16x32xf32>
    %230 = arith.negf %229 : vector<16x32xf32>
    %231 = math.exp %230 : vector<16x32xf32>
    %cst_106 = arith.constant 1.000000e+00 : f32
    %232 = vector.broadcast %cst_106 : f32 to vector<16x32xf32>
    %233 = arith.addf %232, %231 : vector<16x32xf32>
    %234 = arith.divf %232, %233 : vector<16x32xf32>
    %235 = vector.extract_strided_slice %218 {offsets = [0, 64], sizes = [16, 32], strides = [1, 1]} : vector<16x192xf32> to vector<16x32xf32>
    %236 = vector.extract_strided_slice %218 {offsets = [0, 160], sizes = [16, 32], strides = [1, 1]} : vector<16x192xf32> to vector<16x32xf32>
    %237 = arith.mulf %226, %236 : vector<16x32xf32>
    %238 = arith.addf %235, %237 : vector<16x32xf32>
    %239 = math.tanh %238 : vector<16x32xf32>
    %cst_107 = arith.constant 1.000000e+00 : f32
    %240 = vector.broadcast %cst_107 : f32 to vector<16x32xf32>
    %241 = arith.subf %240, %234 : vector<16x32xf32>
    %242 = arith.mulf %241, %239 : vector<16x32xf32>
    %243 = arith.mulf %234, %185 : vector<16x32xf32>
    %244 = arith.addf %242, %243 : vector<16x32xf32>
    %c0_108 = arith.constant 0 : index
    %c0_109 = arith.constant 0 : index
    %245 = vector.load %arg10[%c0_108, %c0_109] : memref<16x32xf32, #tpu.memory_space<vmem>>, vector<16x32xf32>
    tpu.vector_store %arg10[%c0_108, %c0_109], %244 {strides = array<i32>} : memref<16x32xf32, #tpu.memory_space<vmem>>, vector<16x32xf32>,
    return
  }
  func.func @transform_0(%arg0: i32) -> (i32, i32) {
    %c0_i32 = arith.constant 0 : i32
    %c0_i32_0 = arith.constant 0 : i32
    %c0_i32_1 = arith.constant 0 : i32
    return %c0_i32, %c0_i32_0 : i32, i32
  }
  func.func @transform_1(%arg0: i32) -> (i32, i32) {
    %c0_i32 = arith.constant 0 : i32
    %c0_i32_0 = arith.constant 0 : i32
    %c0_i32_1 = arith.constant 0 : i32
    return %c0_i32, %c0_i32_0 : i32, i32
  }
  func.func @transform_3(%arg0: i32) -> (i32, i32) {
    %c0_i32 = arith.constant 0 : i32
    %c0_i32_0 = arith.constant 0 : i32
    %c0_i32_1 = arith.constant 0 : i32
    return %c0_i32, %c0_i32_0 : i32, i32
  }
  func.func @transform_4(%arg0: i32) -> (i32, i32) {
    %c0_i32 = arith.constant 0 : i32
    %c0_i32_0 = arith.constant 0 : i32
    %c0_i32_1 = arith.constant 0 : i32
    return %c0_i32, %c0_i32_0 : i32, i32
  }
  func.func @transform_5(%arg0: i32) -> (i32, i32) {
    %c0_i32 = arith.constant 0 : i32
    %c0_i32_0 = arith.constant 0 : i32
    %c0_i32_1 = arith.constant 0 : i32
    return %c0_i32, %c0_i32_0 : i32, i32
  }
  func.func @transform_6(%arg0: i32) -> (i32, i32) {
    %c0_i32 = arith.constant 0 : i32
    %c0_i32_0 = arith.constant 0 : i32
    %c0_i32_1 = arith.constant 0 : i32
    return %c0_i32, %c0_i32_0 : i32, i32
  }
  func.func @transform_7(%arg0: i32) -> (i32, i32) {
    %c0_i32 = arith.constant 0 : i32
    %c0_i32_0 = arith.constant 0 : i32
    %c0_i32_1 = arith.constant 0 : i32
    return %c0_i32, %c0_i32_0 : i32, i32
  }
  func.func @transform_8(%arg0: i32) -> (i32, i32) {
    %c0_i32 = arith.constant 0 : i32
    %c0_i32_0 = arith.constant 0 : i32
    %c0_i32_1 = arith.constant 0 : i32
    return %c0_i32, %c0_i32_0 : i32, i32
  }
  func.func @transform_9(%arg0: i32) -> (i32, i32) {
    %c0_i32 = arith.constant 0 : i32
    %c0_i32_0 = arith.constant 0 : i32
    %c0_i32_1 = arith.constant 0 : i32
    return %c0_i32, %c0_i32_0 : i32, i32
  }
}

</mosaic_0001>

<bundles_post_ra>
// kernel: tpu_custom_call.1
= control target key start
LH: loop header
LB: loop body
LE: loop exit
PB: predicated region body
PF: predicated region fallthrough
CT: control target
= control target key end

     0   :  { %14 = vsyncpa [#allocation5], 0  ;;  %s2190_s0 = inlined_call_operand.vmem [shape: f32[16,16], index: 0, kind: input, shape index: {}]   ;;  %s2191_s1 = inlined_call_operand.vmem [shape: f32[16,1], index: 1, kind: input, shape index: {}]   ;;  %s2192_s2 = inlined_call_operand.hbm [shape: bf16[4,16,16], index: 2, kind: input, shape index: {}]   ;;  %s2193_s3 = inlined_call_operand.hbm [shape: f32[16,32], index: 3, kind: input, shape index: {}]   ;;  %s2194_s4 = inlined_call_operand.vmem [shape: f32[1,32], index: 4, kind: input, shape index: {}]   ;;  %s2195_s5 = inlined_call_operand.hbm [shape: bf16[32,64], index: 5, kind: input, shape index: {}]   ;;  %s2196_s6 = inlined_call_operand.vmem [shape: f32[1,64], index: 6, kind: input, shape index: {}]   ;;  %s2197_s7 = inlined_call_operand.hbm [shape: bf16[48,192], index: 7, kind: input, shape index: {}]   ;;  %s2198_s8 = inlined_call_operand.vmem [shape: f32[1,192], index: 8, kind: input, shape index: {}]   ;;  %s2199_s9 = inlined_call_operand.hbm [shape: f32[16,32], index: 9, kind: output, shape index: {}]  }
   0x1   :  { %15 = vsyncpa [#allocation8], 0  ;;  %s40_s11 = sshll.u32 %s2195_s5, 4  ;;  %s41_s11 = int_to_ptr.hbm [resolvable:$true] %s40_s11 }
   0x2   :  { %16 = vsyncpa [#allocation6], 0  ;;  %s1776_s12 = smov [#allocation7]   ;;  %s25_s16 = sshll.u32 %s2193_s3, 4  ;;  %s26_s16 = int_to_ptr.hbm [resolvable:$true] %s25_s16 }
   0x3   :  { %s42_s13 = sshll.u32 %s1776_s12, 4  ;;  %s1777_s17 = smov 64   ;;  %s43_s13 = int_to_ptr.vmem [resolvable:$true] %s42_s13 }
   0x4   :  { %s1778_s18 = smov 4   ;;  %s1779_s19 = smov [#allocation4]  }
   0x5   :  { %48 = dma.hbm_to_vmem [thread:$0]  %s41_s11, 256, %s43_s13, [#allocation8], %s1777_s17, %s1777_s17, %s1778_s18  }
   0x6   :  { %s27_s20 = sshll.u32 %s1779_s19, 4  ;;  %s1780_s21 = smov 128   ;;  %s28_s20 = int_to_ptr.vmem [resolvable:$true] %s27_s20 }
   0x7   :  { %s1781_s5 = smov 8   ;;  %s55_s24 = sshll.u32 %s2197_s7, 4  ;;  %s56_s24 = int_to_ptr.hbm [resolvable:$true] %s55_s24 }
   0x8   :  { %33 = dma.hbm_to_vmem [thread:$0]  %s26_s16, 256, %s28_s20, [#allocation5], %s1780_s21, %s1780_s21, %s1781_s5  }
   0x9   :  { %s1782_s3 = smov [#allocation9]  }
   0xa   :  { %s57_s25 = sshll.u32 %s1782_s3, 4  ;;  %s58_s25 = int_to_ptr.vmem [resolvable:$true] %s57_s25 }
   0xb   :  { %63 = dma.hbm_to_vmem [thread:$0]  %s56_s24, 768, %s58_s25, [#allocation8], %s1780_s21, %s1780_s21, %s1781_s5  }
   0xc   :  { %1768 = dma.done.wait [#allocation5], 256  }
   0xd   :  { %1769 = vsyncadd [#allocation5], 4294967040 }
   0xe   :  { %1770 = dma.done.wait [#allocation8], 1024  }
   0xf   :  { %1771 = vsyncadd [#allocation8], 4294966272  ;;  %v130_v0 = vld [vmem:[%s2191_s1] sm:$0xff]  ;;  %v131_v1 = vld [vmem:[%s2191_s1 + $0x8] sm:$0xff]  ;;  %vm100_vm0 = vcmask 130048   ;;  %vm154_vm1 = vcmask 261120  }
  0x10   :  { %v1867_v2 = vld [vmem:[%s2198_s8] sm:$0x3]  ;;  %v95_v3 = vld [vmem:[#allocation4 + $0x8] sm:$0xff]  ;;  %v1509_v7 = vld [vmem:[#allocation7 + $0x8] sm:$0xff]  ;;  %s86_s15 = sshll.u32 %s2192_s2, 4  ;;  %s1783_s16 = smov [#allocation2]   ;;  %s87_s15 = int_to_ptr.hbm [resolvable:$true] %s86_s15 }
  0x11   :  { %v94_v4 = vld [vmem:[#allocation4] sm:$0xff]  ;;  %v93_v5 = vld [vmem:[%s2190_s0 + $0x8] sm:$0xff]  ;;  %1522 = vmatpush.msra.mxu2 %v95_v3  ;;  %121 = vmatpush.msra.mxu0 %v95_v3  ;;  %v1508_v8 = vld [vmem:[#allocation7] sm:$0xff]  ;;  %s88_s18 = sshll.u32 %s1783_s16, 4  ;;  %s89_s18 = int_to_ptr.vmem [resolvable:$true] %s88_s18 }
  0x12   :  { %v92_v6 = vld [vmem:[%s2190_s0] sm:$0xff]  ;;  %164 = vmatpush.bf16.msra.mxu1 %v1509_v7  ;;  %91 = dma.hbm_to_vmem [thread:$0]  %s87_s15, 512, %s89_s18, [#allocation3] }
  0x13   :  { %1523 = vmatpush.msra.mxu2 %v94_v4  ;;  %122 = vmatpush.msra.mxu0 %v94_v4  ;;  %v1539_v9 = vld [vmem:[%s2194_s4] ss:$0 sm:$0xff] }
  0x14   :  { %1406 = vmatmul.msk.f32.vlgmr.msra.gmra.mxu2 %vm100_vm0, %v93_v5  ;;  %1405 = vmatmul.msk.f32.vlgmr.msra.gmra.mxu0 %vm100_vm0, %v92_v6  ;;  %v1893_v15 = vld [vmem:[%s2196_s6] ss:$0 sm:$0xff] }
  0x16   :  { %165 = vmatpush.bf16.msra.mxu1 %v1508_v8 }
  0x91   :  { %v124_v10 = vpop.f32.mrf.mxu0 }
  0x92   :  { %v1880_v11 = vadd.f32 %v1539_v9, %v124_v10 }
  0x97   :  { %v127_v12 = vpop.f32.mrf.mxu2 }
  0x98   :  { %v1882_v13 = vadd.f32 %v1539_v9, %v127_v12 }
  0x9a   :  { %v134_v14 = vpack.c.bf16 %v1882_v13, %v1880_v11 }
  0x9c   :  { %1415 = vmatmul.msk.bf16.vlgmr.msra.gmra.mxu1 %vm154_vm1, %v134_v14 }
 0x119   :  { %v167_v16 = vpop.f32.mrf.mxu1 }
 0x11a   :  { %v168_v17 = vadd.f32 %v1893_v15, %v167_v16 }
 0x11c   :  { %v172_v18 = vpack.c.bf16 %v168_v17, %v168_v17 }
 0x11e   :  { %v191_v22 = vunpack.c.l.b16 %v172_v18 }
 0x121   :  { %v169_v19 = vpop.f32.mrf.mxu1 }
 0x122   :  { %v170_v20 = vadd.f32 %v1893_v15, %v169_v19 }
 0x124   :  { %v173_v21 = vpack.c.bf16 %v170_v20, %v170_v20 }
 0x126   :  { %v192_v23 = vunpack.c.l.b16 %v173_v21 }
 0x127   :  { %1772 = dma.done.wait [#allocation3], 512 }
 0x128   :  { %1773 = vsyncadd [#allocation3], 4294966784  ;;  %v193_v24 = vpack.c.b16 %v192_v23, %v191_v22  ;;  %s1784_s2 = smov 112   ;;  %s1785_s20 = smov 96   ;;  %v1900_v25 = vld [vmem:[#allocation2] sm:$0xff]  ;;  %v1787_v26 = vmov 0   ;;  %v1543_v27 = vpack.i.bf16 %v1882_v13, %v1880_v11 }
 0x129   :  { %s1786_s6 = smov 80   ;;  %1541 = vset.pattern.permute.xlu1 %v1787_v26  ;;  %1542 = vset.pattern.permute.xlu2 %v1787_v26  ;;  %s1788_s22 = smov 16   ;;  %v1906_v29 = vld [vmem:[#allocation2 + $0x8] sm:$0xff]  ;;  %v1908_v31 = vld [vmem:[#allocation2 + $0x10] sm:$0xff]  ;;  %v1914_v33 = vld [vmem:[#allocation2 + $0x18] sm:$0xff]  ;;  %vm361_vm2 = vcmask 392192  }
 0x12a   :  { %194 = vrot.lane.b32.xlu0 %v193_v24, %s1784_s2  ;;  %245 = vrot.lane.b32.xlu1 %v193_v24, %s1785_s20  ;;  %v1454_v34 = vld [vmem:[#allocation9 + $0x20] sm:$0xf]  ;;  %v1519_v35 = vld [vmem:[#allocation9 + $0x24] sm:$0xf0]  ;;  %v1518_v36 = vld [vmem:[#allocation9 + $0x24] sm:$0xf] }
 0x12b   :  { %230 = vmatpush.bf16.msra.mxu3 %v193_v24  ;;  %304 = vperm.xlu2 %1542, %v131_v1   ;;  %v1918_v37 = vor.u32 %v1519_v35, %v1454_v34  ;;  %v1456_v38 = vld [vmem:[#allocation9 + $0x28] sm:$0xf0]  ;;  %v1446_v40 = vld [vmem:[#allocation9 + $0x10] sm:$0xf]  ;;  %v1517_v41 = vld [vmem:[#allocation9 + $0x14] sm:$0xf0] }
 0x12c   :  { %1563 = vset.pattern.permute.xlu0 %v1787_v26  ;;  %v1920_v39 = vor.u32 %v1518_v36, %v1456_v38  ;;  %v1516_v42 = vld [vmem:[#allocation9 + $0x14] sm:$0xf]  ;;  %v1924_v43 = vor.u32 %v1517_v41, %v1446_v40  ;;  %v1448_v44 = vld [vmem:[#allocation9 + $0x18] sm:$0xf0]  ;;  %v1438_v46 = vld [vmem:[#allocation9] sm:$0xf] }
 0x12d   :  { %v1926_v45 = vor.u32 %v1516_v42, %v1448_v44  ;;  %v1515_v47 = vld [vmem:[#allocation9 + $0x4] sm:$0xf0]  ;;  %v1514_v48 = vld [vmem:[#allocation9 + $0x4] sm:$0xf]  ;;  %v1440_v50 = vld [vmem:[#allocation9 + $0x8] sm:$0xf0] }
 0x12e   :  { %1425 = vmatmul.msk.bf16.vlgmr.msra.gmra.mxu3 %vm100_vm0, %v1900_v25  ;;  %384 = vmatpush.bf16.msrb.mxu1 %v1920_v39  ;;  %v1930_v49 = vor.u32 %v1515_v47, %v1438_v46  ;;  %v1932_v51 = vor.u32 %v1514_v48, %v1440_v50  ;;  %v1947_v16 = vperm.slane %v1867_v2, 1  ;;  %v1952_v19 = vperm.slane %v1867_v2, 0  ;;  %s1789_s23 = smov 32   ;;  %s1385_s26 = sshll.u32 %s2199_s9, 4  ;;  %s1386_s26 = int_to_ptr.hbm [resolvable:$true] %s1385_s26 }
 0x12f   :  { %370 = vmatpush.bf16.msrb.mxu3 %v1918_v37 }
 0x132   :  { %275 = vrot.lane.b32.xlu0 %v193_v24, %s1786_s6  ;;  %299 = vperm.xlu1 %1541, %v130_v0  }
 0x133   :  { %1544 = vrot.lane.b32.xlu2 %v1543_v27, %s1788_s22  ;;  %371 = vmatpush.bf16.msrb.mxu3 %v1924_v43 }
 0x134   :  { %385 = vmatpush.bf16.msrb.mxu1 %v1926_v45 }
 0x137   :  { %372 = vmatpush.bf16.msrb.mxu3 %v1930_v49 }
 0x138   :  { %386 = vmatpush.bf16.msrb.mxu1 %v1932_v51 }
 0x185   :  { %v1936_v56 = vpop.permute.xlu2 %304 }
 0x18d   :  { %v1545_v0 = vpop.permute.xlu2 %1544 }
 0x18e   :  { %v1547_v5 = vunpack.i.h.bf16 %v1545_v0  ;;  %v1546_v6 = vunpack.i.l.bf16 %v1545_v0 }
 0x19c   :  { %v195_v28 = vpop.permute.xlu0 %194  ;;  %v246_v30 = vpop.permute.xlu1 %245 }
 0x19d   :  { %207 = vmatpush.bf16.msrb.mxu2 %v195_v28  ;;  %258 = vmatpush.bf16.msrb.mxu0 %v246_v30 }
 0x1a0   :  { %1420 = vmatmul.msk.bf16.vlgmr.msrb.gmra.mxu2 %vm100_vm0, %v1906_v29  ;;  %1430 = vmatmul.msk.bf16.vlgmr.msrb.gmra.mxu0 %vm100_vm0, %v1908_v31 }
 0x1a4   :  { %v276_v32 = vpop.permute.xlu0 %275  ;;  %v1938_v1 = vpop.permute.xlu1 %299 }
 0x1a5   :  { %288 = vmatpush.bf16.msra.mxu2 %v276_v32 }
 0x1b0   :  { %1435 = vmatmul.msk.bf16.vlgmr.msra.gmra.mxu2 %vm100_vm0, %v1914_v33 }
 0x1b1   :  { %v232_v53 = vpop.f32.mrf.mxu3 }
 0x1b9   :  { %v234_v58 = vpop.f32.mrf.mxu3 }
 0x21d   :  { %v260_v55 = vpop.f32.mrf.mxu0 }
 0x223   :  { %v209_v52 = vpop.f32.mrf.mxu2 }
 0x224   :  { %v233_v57 = vadd.f32 %v232_v53, %v209_v52 }
 0x225   :  { %v262_v62 = vpop.f32.mrf.mxu0 }
 0x226   :  { %v265_v60 = vadd.f32 %v260_v55, %v233_v57 }
 0x22b   :  { %v211_v54 = vpop.f32.mrf.mxu2 }
 0x22c   :  { %v235_v61 = vadd.f32 %v234_v58, %v211_v54 }
 0x22e   :  { %v266_v3 = vadd.f32 %v262_v62, %v235_v61 }
 0x233   :  { %v290_v59 = vpop.f32.mrf.mxu2 }
 0x234   :  { %v295_v63 = vadd.f32 %v290_v59, %v265_v60 }
 0x236   :  { %v307_v7 = vmul.f32 %v1938_v1, %v295_v63 }
 0x238   :  { %v317_v10 = vsel %vm100_vm0, %v307_v7, %v1546_v6 }
 0x23b   :  { %v292_v4 = vpop.f32.mrf.mxu2 }
 0x23c   :  { %v296_v8 = vadd.f32 %v292_v4, %v266_v3 }
 0x23e   :  { %v308_v9 = vmul.f32 %v1936_v56, %v296_v8 }
 0x240   :  { %v318_v12 = vsel %vm100_vm0, %v308_v9, %v1547_v5 }
 0x241   :  { %v319_v14 = vpack.c.bf16 %v318_v12, %v317_v10 }
 0x243   :  { %1460 = vmatmul.msk.bf16.vlgmr.msrb.gmra.mxu3 %vm361_vm2, %v319_v14  ;;  %1461 = vmatmul.msk.bf16.vlgmr.msrb.gmra.mxu1 %vm361_vm2, %v319_v14 }
 0x2c0   :  { %v388_v17 = vpop.f32.mrf.mxu1 }
 0x2c1   :  { %v389_v18 = vadd.f32 %v388_v17, %v1947_v16 }
 0x2c3   :  { %489 = vrot.lane.b32.xlu2 %v389_v18, %s1785_s20 }
 0x2c6   :  { %v374_v20 = vpop.f32.mrf.mxu3 }
 0x2c7   :  { %v1955_v21 = vadd.f32 %v374_v20, %v1952_v19 }
 0x2c8   :  { %v390_v22 = vpop.f32.mrf.mxu1 }
 0x2c9   :  { %395 = vrot.lane.b32.xlu0 %v1955_v21, %s1789_s23  ;;  %v391_v24 = vadd.f32 %v390_v22, %v1947_v16 }
 0x2ce   :  { %v376_v23 = vpop.f32.mrf.mxu3 }
 0x2cf   :  { %v1961_v26 = vadd.f32 %v376_v23, %v1952_v19 }
 0x2d1   :  { %397 = vrot.lane.b32.xlu1 %v1961_v26, %s1789_s23  ;;  %491 = vrot.lane.b32.xlu0 %v391_v24, %s1785_s20 }
 0x2d9   :  { %443 = vrot.lane.b32.xlu0 %v389_v18, %s1789_s23 }
 0x31d   :  { %v490_v57 = vpop.permute.xlu2 %489 }
 0x33b   :  { %v396_v2 = vpop.permute.xlu0 %395 }
 0x33c   :  { %v401_v27 = vadd.f32 %v396_v2, %v1955_v21 }
 0x33e   :  { %v1462_v28 = vmul.f32 -1.442695, %v401_v27 }
 0x340   :  { %1564 = vpow2.f32 %v1462_v28 }
 0x343   :  { %v398_v30 = vpop.permute.xlu1 %397  ;;  %v492_v6 = vpop.permute.xlu0 %491 }
 0x344   :  { %v402_v32 = vadd.f32 %v398_v30, %v1961_v26 }
 0x346   :  { %v1565_v34 = vpop.eup %1564  ;;  %v1463_v35 = vmul.f32 -1.442695, %v402_v32 }
 0x347   :  { %v409_v36 = vadd.f32 1.0, %v1565_v34 }
 0x348   :  { %1566 = vpow2.f32 %v1463_v35 }
 0x349   :  { %1568 = vrcp.f32 %v409_v36  ;;  %v422_v46 = vand.u32 2147483648, %v409_v36  ;;  %v420_v48 = vand.u32 2147483647, %v409_v36  ;;  %vm416_vm4 = vweird.f32 %v409_v36 }
 0x34b   :  { %v423_v53 = vor.u32 1.1754944e-38, %v422_v46  ;;  %vm421_vm6 = vcmp.eq.f32.partialorder %v420_v48, 8.507059e+37  ;;  %v444_v18 = vpop.permute.xlu0 %443 }
 0x34e   :  { %v1567_v38 = vpop.eup %1566 }
 0x34f   :  { %v1569_v40 = vpop.eup %1568  ;;  %v410_v41 = vadd.f32 1.0, %v1567_v38 }
 0x350   :  { %v412_v42 = vmul.f32 %v1569_v40, %v409_v36  ;;  %vm417_vm3 = vweird.f32 %v1569_v40 }
 0x351   :  { %1570 = vrcp.f32 %v410_v41  ;;  %vm418_vm5 = vmor %vm416_vm4, %vm417_vm3  ;;  %v437_v61 = vand.u32 2147483648, %v410_v41  ;;  %v435_v63 = vand.u32 2147483647, %v410_v41  ;;  %vm431_vm8 = vweird.f32 %v410_v41 }
 0x352   :  { %v413_v44 = vsub.f32 1.0, %v412_v42 }
 0x353   :  { %v438_v3 = vor.u32 1.1754944e-38, %v437_v61  ;;  %vm436_vm10 = vcmp.eq.f32.partialorder %v435_v63, 8.507059e+37 }
 0x354   :  { %v414_v47 = vmul.f32 %v1569_v40, %v413_v44 }
 0x356   :  { %v415_v50 = vadd.f32 %v1569_v40, %v414_v47 }
 0x357   :  { %v1571_v52 = vpop.eup %1570 }
 0x358   :  { %v427_v54 = vmul.f32 %v1571_v52, %v410_v41  ;;  %v419_v55 = vsel %vm418_vm5, %v1569_v40, %v415_v50  ;;  %vm432_vm7 = vweird.f32 %v1571_v52 }
 0x359   :  { %v424_v58 = vsel %vm421_vm6, %v423_v53, %v419_v55  ;;  %vm433_vm9 = vmor %vm431_vm8, %vm432_vm7 }
 0x35a   :  { %v428_v59 = vsub.f32 1.0, %v427_v54  ;;  %v495_v60 = vmul.f32 %v490_v57, %v424_v58 }
 0x35c   :  { %v429_v62 = vmul.f32 %v1571_v52, %v428_v59  ;;  %499 = vrot.lane.b32.xlu1 %v495_v60, %s1777_s17 }
 0x35e   :  { %v430_v0 = vadd.f32 %v1571_v52, %v429_v62 }
 0x360   :  { %v434_v4 = vsel %vm433_vm9, %v1571_v52, %v430_v0 }
 0x361   :  { %v439_v5 = vsel %vm436_vm10, %v438_v3, %v434_v4 }
 0x362   :  { %v496_v7 = vmul.f32 %v492_v6, %v439_v5 }
 0x364   :  { %445 = vrot.lane.b32.xlu1 %v391_v24, %s1789_s23  ;;  %501 = vrot.lane.b32.xlu2 %v496_v7, %s1777_s17 }
 0x36c   :  { %521 = vrot.lane.b32.xlu1 %v1880_v11, %s1789_s23  ;;  %v449_v11 = vadd.f32 %v444_v18, %v1955_v21 }
 0x36e   :  { %v1464_v23 = vmul.f32 -1.442695, %v449_v11 }
 0x3be   :  { %v502_v8 = vpop.permute.xlu2 %501 }
 0x3bf   :  { %v506_v9 = vadd.f32 %v502_v8, %v1961_v26 }
 0x3c1   :  { %1572 = vtanh.f32 %v506_v9 }
 0x3c7   :  { %v1573_v10 = vpop.eup %1572 }
 0x3c8   :  { %515 = vrot.lane.b32.xlu0 %v1573_v10, %s1785_s20 }
 0x3ce   :  { %v500_v12 = vpop.permute.xlu1 %499 }
 0x3cf   :  { %v505_v14 = vadd.f32 %v500_v12, %v1955_v21  ;;  %v1985_v21 = vld [vmem:[#allocation7] sm:$0xff] }
 0x3d1   :  { %1574 = vtanh.f32 %v505_v14 }
 0x3d2   :  { %1576 = vpow2.f32 %v1464_v23 }
 0x3d6   :  { %v446_v20 = vpop.permute.xlu1 %445 }
 0x3d7   :  { %v1575_v17 = vpop.eup %1574  ;;  %v450_v22 = vadd.f32 %v446_v20, %v1961_v26 }
 0x3d8   :  { %513 = vrot.lane.b32.xlu2 %v1575_v17, %s1785_s20  ;;  %v1577_v2 = vpop.eup %1576 }
 0x3d9   :  { %v1465_v24 = vmul.f32 -1.442695, %v450_v22  ;;  %v457_v28 = vadd.f32 1.0, %v1577_v2 }
 0x3db   :  { %1578 = vpow2.f32 %v1465_v24  ;;  %v470_v44 = vand.u32 2147483648, %v457_v28  ;;  %vm464_vm12 = vweird.f32 %v457_v28  ;;  %v468_v46 = vand.u32 2147483647, %v457_v28 }
 0x3dc   :  { %1580 = vrcp.f32 %v457_v28 }
 0x3dd   :  { %v471_v53 = vor.u32 1.1754944e-38, %v470_v44  ;;  %vm469_vm4 = vcmp.eq.f32.partialorder %v468_v46, 8.507059e+37 }
 0x3de   :  { %v522_v61 = vpop.permute.xlu1 %521 }
 0x3e0   :  { %523 = vrot.lane.b32.xlu2 %v1882_v13, %s1789_s23  ;;  %v1982_v13 = vld [vmem:[#allocation7 + $0x8] sm:$0xff] }
 0x3e1   :  { %v1579_v27 = vpop.eup %1578  ;;  %560 = vmatpush.bf16.msra.mxu0 %v1982_v13 }
 0x3e2   :  { %v458_v30 = vadd.f32 1.0, %v1579_v27  ;;  %v1581_v32 = vpop.eup %1580 }
 0x3e3   :  { %v460_v35 = vmul.f32 %v1581_v32, %v457_v28  ;;  %vm465_vm11 = vweird.f32 %v1581_v32 }
 0x3e4   :  { %1582 = vrcp.f32 %v458_v30  ;;  %vm466_vm14 = vmor %vm464_vm12, %vm465_vm11  ;;  %v485_v48 = vand.u32 2147483648, %v458_v30  ;;  %vm479_vm15 = vweird.f32 %v458_v30  ;;  %v483_v52 = vand.u32 2147483647, %v458_v30 }
 0x3e5   :  { %v461_v26 = vsub.f32 1.0, %v460_v35  ;;  %561 = vmatpush.bf16.msra.mxu0 %v1985_v21 }
 0x3e6   :  { %v486_v58 = vor.u32 1.1754944e-38, %v485_v48  ;;  %vm484_vm5 = vcmp.eq.f32.partialorder %v483_v52, 8.507059e+37 }
 0x3e7   :  { %v462_v40 = vmul.f32 %v1581_v32, %v461_v26 }
 0x3e9   :  { %v463_v42 = vadd.f32 %v1581_v32, %v462_v40 }
 0x3ea   :  { %v1583_v34 = vpop.eup %1582 }
 0x3eb   :  { %v475_v36 = vmul.f32 %v1583_v34, %v458_v30  ;;  %vm480_vm13 = vweird.f32 %v1583_v34  ;;  %v467_v50 = vsel %vm466_vm14, %v1581_v32, %v463_v42 }
 0x3ec   :  { %vm481_vm3 = vmor %vm479_vm15, %vm480_vm13  ;;  %v472_v57 = vsel %vm469_vm4, %v471_v53, %v467_v50 }
 0x3ed   :  { %v476_v38 = vsub.f32 1.0, %v475_v36  ;;  %v509_v60 = vsub.f32 1.0, %v472_v57  ;;  %v527_v4 = vmul.f32 %v522_v61, %v472_v57 }
 0x3ef   :  { %v477_v41 = vmul.f32 %v1583_v34, %v476_v38 }
 0x3f1   :  { %v478_v47 = vadd.f32 %v1583_v34, %v477_v41 }
 0x3f3   :  { %v482_v55 = vsel %vm481_vm3, %v1583_v34, %v478_v47 }
 0x3f4   :  { %v487_v59 = vsel %vm484_vm5, %v486_v58, %v482_v55 }
 0x3f5   :  { %v510_v63 = vsub.f32 1.0, %v487_v59 }
 0x432   :  { %v514_v54 = vpop.permute.xlu2 %513 }
 0x433   :  { %v519_v62 = vmul.f32 %v514_v54, %v509_v60 }
 0x435   :  { %v1988_v7 = vadd.f32 %v527_v4, %v519_v62 }
 0x43a   :  { %v524_v0 = vpop.permute.xlu2 %523  ;;  %v516_v3 = vpop.permute.xlu0 %515 }
 0x43b   :  { %v528_v5 = vmul.f32 %v524_v0, %v487_v59  ;;  %v520_v6 = vmul.f32 %v516_v3, %v510_v63 }
 0x43d   :  { %v1990_v8 = vadd.f32 %v528_v5, %v520_v6 }
 0x43f   :  { %v531_v9 = vpack.c.bf16 %v1990_v8, %v1988_v7  ;;  %v1548_v2 = vpack.i.bf16 %v1990_v8, %v1988_v7 }
 0x441   :  { %537 = vrot.lane.b32.xlu0 %v531_v9, %s1785_s20 }
 0x4b3   :  { %v538_v10 = vpop.permute.xlu0 %537 }
 0x4b4   :  { %1474 = vmatmul.msk.bf16.vlgmr.msra.gmra.mxu0 %vm154_vm1, %v538_v10 }
 0x531   :  { %v563_v12 = vpop.f32.mrf.mxu0 }
 0x532   :  { %v564_v14 = vadd.f32 %v1893_v15, %v563_v12 }
 0x534   :  { %v568_v18 = vpack.c.bf16 %v564_v14, %v564_v14 }
 0x536   :  { %v572_v22 = vunpack.c.l.b16 %v568_v18 }
 0x539   :  { %v565_v17 = vpop.f32.mrf.mxu0 }
 0x53a   :  { %v566_v20 = vadd.f32 %v1893_v15, %v565_v17 }
 0x53c   :  { %v569_v11 = vpack.c.bf16 %v566_v20, %v566_v20 }
 0x53e   :  { %v573_v23 = vunpack.c.l.b16 %v569_v11 }
 0x540   :  { %v574_v24 = vpack.c.b16 %v573_v23, %v572_v22 }
 0x542   :  { %626 = vrot.lane.b32.xlu0 %v574_v24, %s1786_s6  ;;  %607 = vrot.lane.b32.xlu2 %v574_v24, %s1785_s20 }
 0x543   :  { %575 = vrot.lane.b32.xlu1 %v574_v24, %s1784_s2  ;;  %600 = vmatpush.bf16.msra.mxu3 %v574_v24 }
 0x546   :  { %1476 = vmatmul.msk.bf16.vlgmr.msra.gmra.mxu3 %vm100_vm0, %v1900_v25 }
 0x547   :  { %680 = vmatpush.bf16.msrb.mxu3 %v1920_v39 }
 0x54b   :  { %681 = vmatpush.bf16.msrb.mxu3 %v1926_v45  ;;  %1549 = vrot.lane.b32.xlu1 %v1548_v2, %s1784_s2 }
 0x54f   :  { %682 = vmatpush.bf16.msrb.mxu3 %v1932_v51 }
 0x59c   :  { %v608_v27 = vpop.permute.xlu2 %607 }
 0x59d   :  { %617 = vmatpush.bf16.msra.mxu1 %v608_v27 }
 0x5a0   :  { %1477 = vmatmul.msk.bf16.vlgmr.msra.gmra.mxu1 %vm100_vm0, %v1908_v31 }
 0x5a1   :  { %834 = vmatpush.bf16.msrb.mxu1 %v1982_v13 }
 0x5a5   :  { %835 = vmatpush.bf16.msrb.mxu1 %v1985_v21 }
 0x5b4   :  { %v627_v28 = vpop.permute.xlu0 %626 }
 0x5b5   :  { %v576_v30 = vpop.permute.xlu1 %575  ;;  %636 = vmatpush.bf16.msrb.mxu0 %v627_v28 }
 0x5b6   :  { %585 = vmatpush.bf16.msrb.mxu2 %v576_v30 }
 0x5b8   :  { %1478 = vmatmul.msk.bf16.vlgmr.msrb.gmra.mxu0 %vm100_vm0, %v1914_v33 }
 0x5b9   :  { %1475 = vmatmul.msk.bf16.vlgmr.msrb.gmra.mxu2 %vm100_vm0, %v1906_v29 }
 0x5ba   :  { %666 = vmatpush.bf16.msra.mxu2 %v1918_v37 }
 0x5bd   :  { %v1550_v48 = vpop.permute.xlu1 %1549 }
 0x5be   :  { %667 = vmatpush.bf16.msra.mxu2 %v1924_v43  ;;  %v1552_v54 = vunpack.i.h.bf16 %v1550_v48  ;;  %v1551_v55 = vunpack.i.l.bf16 %v1550_v48 }
 0x5c2   :  { %668 = vmatpush.bf16.msra.mxu2 %v1930_v49 }
 0x5c9   :  { %v602_v32 = vpop.f32.mrf.mxu3 }
 0x5d1   :  { %v604_v40 = vpop.f32.mrf.mxu3 }
 0x61d   :  { %v619_v34 = vpop.f32.mrf.mxu1 }
 0x625   :  { %v621_v46 = vpop.f32.mrf.mxu1 }
 0x635   :  { %v638_v26 = vpop.f32.mrf.mxu0 }
 0x63c   :  { %v587_v35 = vpop.f32.mrf.mxu2 }
 0x63d   :  { %v603_v36 = vadd.f32 %v602_v32, %v587_v35  ;;  %v640_v50 = vpop.f32.mrf.mxu0 }
 0x63f   :  { %v624_v38 = vadd.f32 %v619_v34, %v603_v36 }
 0x641   :  { %v643_v42 = vadd.f32 %v638_v26, %v624_v38 }
 0x643   :  { %v645_v52 = vmul.f32 %v643_v42, %v1938_v1 }
 0x644   :  { %v589_v41 = vpop.f32.mrf.mxu2 }
 0x645   :  { %v605_v44 = vadd.f32 %v604_v40, %v589_v41  ;;  %v655_v58 = vsel %vm100_vm0, %v645_v52, %v1551_v55 }
 0x647   :  { %v625_v47 = vadd.f32 %v621_v46, %v605_v44 }
 0x649   :  { %v644_v53 = vadd.f32 %v640_v50, %v625_v47 }
 0x64b   :  { %v646_v57 = vmul.f32 %v644_v53, %v1936_v56 }
 0x64d   :  { %v656_v59 = vsel %vm100_vm0, %v646_v57, %v1552_v54 }
 0x64e   :  { %v657_v60 = vpack.c.bf16 %v656_v59, %v655_v58 }
 0x650   :  { %1479 = vmatmul.msk.bf16.vlgmr.msra.gmra.mxu2 %vm361_vm2, %v657_v60  ;;  %1480 = vmatmul.msk.bf16.vlgmr.msrb.gmra.mxu3 %vm361_vm2, %v657_v60 }
 0x6d3   :  { %v670_v61 = vpop.f32.mrf.mxu2  ;;  %v684_v62 = vpop.f32.mrf.mxu3 }
 0x6d4   :  { %v2027_v63 = vadd.f32 %v670_v61, %v1952_v19  ;;  %v685_v0 = vadd.f32 %v684_v62, %v1947_v16 }
 0x6d6   :  { %785 = vrot.lane.b32.xlu1 %v685_v0, %s1785_s20  ;;  %691 = vrot.lane.b32.xlu2 %v2027_v63, %s1789_s23 }
 0x6db   :  { %v672_v3 = vpop.f32.mrf.mxu2  ;;  %v686_v4 = vpop.f32.mrf.mxu3 }
 0x6dc   :  { %v2034_v5 = vadd.f32 %v672_v3, %v1952_v19  ;;  %v687_v6 = vadd.f32 %v686_v4, %v1947_v16 }
 0x6de   :  { %693 = vrot.lane.b32.xlu0 %v2034_v5, %s1789_s23  ;;  %787 = vrot.lane.b32.xlu2 %v687_v6, %s1785_s20 }
 0x6e6   :  { %739 = vrot.lane.b32.xlu2 %v685_v0, %s1789_s23 }
 0x730   :  { %v692_v9 = vpop.permute.xlu2 %691 }
 0x731   :  { %v697_v10 = vadd.f32 %v692_v9, %v2027_v63 }
 0x733   :  { %v1481_v12 = vmul.f32 -1.442695, %v697_v10 }
 0x735   :  { %1584 = vpow2.f32 %v1481_v12 }
 0x738   :  { %v788_v54 = vpop.permute.xlu2 %787 }
 0x73b   :  { %v1585_v14 = vpop.eup %1584 }
 0x73c   :  { %v705_v17 = vadd.f32 1.0, %v1585_v14 }
 0x73e   :  { %1586 = vrcp.f32 %v705_v17  ;;  %v718_v22 = vand.u32 2147483648, %v705_v17  ;;  %v716_v24 = vand.u32 2147483647, %v705_v17  ;;  %vm712_vm7 = vweird.f32 %v705_v17 }
 0x740   :  { %v719_v27 = vor.u32 1.1754944e-38, %v718_v22  ;;  %vm717_vm9 = vcmp.eq.f32.partialorder %v716_v24, 8.507059e+37  ;;  %v740_v3 = vpop.permute.xlu2 %739 }
 0x744   :  { %v1587_v18 = vpop.eup %1586 }
 0x745   :  { %v708_v20 = vmul.f32 %v1587_v18, %v705_v17  ;;  %vm713_vm6 = vweird.f32 %v1587_v18 }
 0x746   :  { %vm714_vm8 = vmor %vm712_vm7, %vm713_vm6 }
 0x747   :  { %v709_v11 = vsub.f32 1.0, %v708_v20 }
 0x748   :  { %v786_v30 = vpop.permute.xlu1 %785 }
 0x749   :  { %v710_v23 = vmul.f32 %v1587_v18, %v709_v11 }
 0x74b   :  { %v711_v2 = vadd.f32 %v1587_v18, %v710_v23 }
 0x74d   :  { %v715_v28 = vsel %vm714_vm8, %v1587_v18, %v711_v2 }
 0x74e   :  { %v720_v32 = vsel %vm717_vm9, %v719_v27, %v715_v28 }
 0x74f   :  { %v791_v34 = vmul.f32 %v786_v30, %v720_v32 }
 0x750   :  { %v694_v35 = vpop.permute.xlu0 %693 }
 0x751   :  { %v698_v36 = vadd.f32 %v694_v35, %v2034_v5  ;;  %795 = vrot.lane.b32.xlu0 %v791_v34, %s1777_s17 }
 0x753   :  { %v1482_v26 = vmul.f32 -1.442695, %v698_v36 }
 0x755   :  { %1588 = vpow2.f32 %v1482_v26 }
 0x759   :  { %741 = vrot.lane.b32.xlu0 %v687_v6, %s1789_s23  ;;  %v745_v6 = vadd.f32 %v740_v3, %v2027_v63 }
 0x75b   :  { %v1589_v38 = vpop.eup %1588  ;;  %v1483_v10 = vmul.f32 -1.442695, %v745_v6 }
 0x75c   :  { %v706_v40 = vadd.f32 1.0, %v1589_v38 }
 0x75e   :  { %1590 = vrcp.f32 %v706_v40  ;;  %v733_v46 = vand.u32 2147483648, %v706_v40  ;;  %v731_v48 = vand.u32 2147483647, %v706_v40  ;;  %vm727_vm11 = vweird.f32 %v706_v40 }
 0x760   :  { %v734_v52 = vor.u32 1.1754944e-38, %v733_v46  ;;  %vm732_vm13 = vcmp.eq.f32.partialorder %v731_v48, 8.507059e+37 }
 0x764   :  { %v1591_v41 = vpop.eup %1590 }
 0x765   :  { %v723_v42 = vmul.f32 %v1591_v41, %v706_v40  ;;  %vm728_vm10 = vweird.f32 %v1591_v41 }
 0x766   :  { %vm729_vm12 = vmor %vm727_vm11, %vm728_vm10 }
 0x767   :  { %v724_v44 = vsub.f32 1.0, %v723_v42 }
 0x769   :  { %v725_v47 = vmul.f32 %v1591_v41, %v724_v44 }
 0x76b   :  { %v726_v50 = vadd.f32 %v1591_v41, %v725_v47 }
 0x76d   :  { %v730_v53 = vsel %vm729_vm12, %v1591_v41, %v726_v50 }
 0x76e   :  { %v735_v55 = vsel %vm732_vm13, %v734_v52, %v730_v53 }
 0x76f   :  { %v792_v57 = vmul.f32 %v788_v54, %v735_v55 }
 0x771   :  { %797 = vrot.lane.b32.xlu1 %v792_v57, %s1777_s17 }
 0x7c3   :  { %v796_v58 = vpop.permute.xlu0 %795 }
 0x7c4   :  { %v801_v59 = vadd.f32 %v796_v58, %v2027_v63 }
 0x7c6   :  { %1592 = vtanh.f32 %v801_v59 }
 0x7cb   :  { %v742_v4 = vpop.permute.xlu0 %741 }
 0x7cc   :  { %v1593_v60 = vpop.eup %1592  ;;  %v746_v9 = vadd.f32 %v742_v4, %v2034_v5 }
 0x7cd   :  { %809 = vrot.lane.b32.xlu1 %v1593_v60, %s1785_s20 }
 0x7ce   :  { %v1484_v12 = vmul.f32 -1.442695, %v746_v9 }
 0x7e3   :  { %v798_v61 = vpop.permute.xlu1 %797 }
 0x7e4   :  { %v802_v62 = vadd.f32 %v798_v61, %v2034_v5 }
 0x7e6   :  { %1594 = vtanh.f32 %v802_v62 }
 0x7e7   :  { %1596 = vpow2.f32 %v1483_v10 }
 0x7e8   :  { %1598 = vpow2.f32 %v1484_v12 }
 0x7ec   :  { %v1595_v0 = vpop.eup %1594 }
 0x7ed   :  { %811 = vrot.lane.b32.xlu2 %v1595_v0, %s1785_s20  ;;  %v1597_v14 = vpop.eup %1596 }
 0x7ee   :  { %v1599_v17 = vpop.eup %1598  ;;  %v753_v18 = vadd.f32 1.0, %v1597_v14 }
 0x7ef   :  { %v754_v20 = vadd.f32 1.0, %v1599_v17 }
 0x7f0   :  { %1600 = vrcp.f32 %v753_v18  ;;  %v766_v5 = vand.u32 2147483648, %v753_v18  ;;  %vm760_vm15 = vweird.f32 %v753_v18  ;;  %v764_v32 = vand.u32 2147483647, %v753_v18 }
 0x7f1   :  { %1602 = vrcp.f32 %v754_v20  ;;  %v781_v35 = vand.u32 2147483648, %v754_v20  ;;  %vm775_vm5 = vweird.f32 %v754_v20  ;;  %v779_v26 = vand.u32 2147483647, %v754_v20 }
 0x7f2   :  { %v767_v38 = vor.u32 1.1754944e-38, %v766_v5  ;;  %vm765_vm7 = vcmp.eq.f32.partialorder %v764_v32, 8.507059e+37 }
 0x7f3   :  { %v782_v42 = vor.u32 1.1754944e-38, %v781_v35  ;;  %vm780_vm8 = vcmp.eq.f32.partialorder %v779_v26, 8.507059e+37 }
 0x7f6   :  { %v1601_v11 = vpop.eup %1600 }
 0x7f7   :  { %v1603_v22 = vpop.eup %1602  ;;  %v756_v23 = vmul.f32 %v1601_v11, %v753_v18  ;;  %vm761_vm14 = vweird.f32 %v1601_v11 }
 0x7f8   :  { %v771_v24 = vmul.f32 %v1603_v22, %v754_v20  ;;  %vm776_vm3 = vweird.f32 %v1603_v22  ;;  %vm762_vm4 = vmor %vm760_vm15, %vm761_vm14 }
 0x7f9   :  { %v757_v2 = vsub.f32 1.0, %v756_v23  ;;  %vm777_vm6 = vmor %vm775_vm5, %vm776_vm3 }
 0x7fa   :  { %v772_v27 = vsub.f32 1.0, %v771_v24 }
 0x7fb   :  { %v758_v28 = vmul.f32 %v1601_v11, %v757_v2 }
 0x7fc   :  { %v773_v63 = vmul.f32 %v1603_v22, %v772_v27 }
 0x7fd   :  { %v759_v30 = vadd.f32 %v1601_v11, %v758_v28 }
 0x7fe   :  { %v774_v34 = vadd.f32 %v1603_v22, %v773_v63 }
 0x7ff   :  { %v763_v36 = vsel %vm762_vm4, %v1601_v11, %v759_v30 }
 0x800   :  { %v778_v40 = vsel %vm777_vm6, %v1603_v22, %v774_v34  ;;  %v768_v41 = vsel %vm765_vm7, %v767_v38, %v763_v36 }
 0x801   :  { %v783_v46 = vsel %vm780_vm8, %v782_v42, %v778_v40  ;;  %v805_v47 = vsub.f32 1.0, %v768_v41  ;;  %v817_v53 = vmul.f32 %v768_v41, %v1988_v7 }
 0x802   :  { %v806_v50 = vsub.f32 1.0, %v783_v46  ;;  %v818_v54 = vmul.f32 %v783_v46, %v1990_v8 }
 0x83f   :  { %v810_v44 = vpop.permute.xlu1 %809 }
 0x840   :  { %v815_v48 = vmul.f32 %v810_v44, %v805_v47 }
 0x842   :  { %v2054_v57 = vadd.f32 %v817_v53, %v815_v48 }
 0x847   :  { %v812_v52 = vpop.permute.xlu2 %811 }
 0x848   :  { %v816_v55 = vmul.f32 %v812_v52, %v806_v50 }
 0x84a   :  { %v2056_v58 = vadd.f32 %v818_v54, %v816_v55 }
 0x84c   :  { %v821_v59 = vpack.c.bf16 %v2056_v58, %v2054_v57  ;;  %v1553_v10 = vpack.i.bf16 %v2056_v58, %v2054_v57 }
 0x84e   :  { %823 = vrot.lane.b32.xlu0 %v821_v59, %s1785_s20 }
 0x8c0   :  { %v824_v60 = vpop.permute.xlu0 %823 }
 0x8c1   :  { %1485 = vmatmul.msk.bf16.vlgmr.msrb.gmra.mxu1 %vm154_vm1, %v824_v60 }
 0x93e   :  { %v837_v61 = vpop.f32.mrf.mxu1 }
 0x93f   :  { %v838_v62 = vadd.f32 %v1893_v15, %v837_v61 }
 0x941   :  { %v842_v7 = vpack.c.bf16 %v838_v62, %v838_v62 }
 0x943   :  { %v846_v4 = vunpack.c.l.b16 %v842_v7 }
 0x946   :  { %v839_v0 = vpop.f32.mrf.mxu1 }
 0x947   :  { %v840_v8 = vadd.f32 %v1893_v15, %v839_v0 }
 0x949   :  { %v843_v3 = vpack.c.bf16 %v840_v8, %v840_v8 }
 0x94b   :  { %v847_v6 = vunpack.c.l.b16 %v843_v3 }
 0x94d   :  { %v848_v9 = vpack.c.b16 %v847_v6, %v846_v4 }
 0x94f   :  { %900 = vrot.lane.b32.xlu0 %v848_v9, %s1786_s6  ;;  %849 = vrot.lane.b32.xlu2 %v848_v9, %s1784_s2 }
 0x950   :  { %881 = vrot.lane.b32.xlu1 %v848_v9, %s1785_s20  ;;  %874 = vmatpush.bf16.msrb.mxu2 %v848_v9 }
 0x953   :  { %1487 = vmatmul.msk.bf16.vlgmr.msrb.gmra.mxu2 %vm100_vm0, %v1900_v25 }
 0x954   :  { %954 = vmatpush.bf16.msra.mxu2 %v1920_v39 }
 0x958   :  { %955 = vmatpush.bf16.msra.mxu2 %v1926_v45  ;;  %1554 = vrot.lane.b32.xlu1 %v1553_v10, %s1784_s2 }
 0x95c   :  { %956 = vmatpush.bf16.msra.mxu2 %v1932_v51 }
 0x9a9   :  { %v850_v12 = vpop.permute.xlu2 %849 }
 0x9aa   :  { %859 = vmatpush.bf16.msra.mxu0 %v850_v12 }
 0x9ad   :  { %1486 = vmatmul.msk.bf16.vlgmr.msra.gmra.mxu0 %vm100_vm0, %v1906_v29 }
 0x9ae   :  { %940 = vmatpush.bf16.msrb.mxu0 %v1918_v37 }
 0x9b2   :  { %941 = vmatpush.bf16.msrb.mxu0 %v1924_v43 }
 0x9b6   :  { %942 = vmatpush.bf16.msrb.mxu0 %v1930_v49 }
 0x9c1   :  { %v901_v25 = vpop.permute.xlu0 %900 }
 0x9c2   :  { %v882_v14 = vpop.permute.xlu1 %881  ;;  %910 = vmatpush.bf16.msra.mxu1 %v901_v25 }
 0x9c3   :  { %891 = vmatpush.bf16.msra.mxu3 %v882_v14 }
 0x9c5   :  { %1489 = vmatmul.msk.bf16.vlgmr.msra.gmra.mxu1 %vm100_vm0, %v1914_v33 }
 0x9c6   :  { %1488 = vmatmul.msk.bf16.vlgmr.msra.gmra.mxu3 %vm100_vm0, %v1908_v31 }
 0x9c7   :  { %1108 = vmatpush.bf16.msrb.mxu3 %v1982_v13 }
 0x9ca   :  { %v1555_v63 = vpop.permute.xlu1 %1554 }
 0x9cb   :  { %1109 = vmatpush.bf16.msrb.mxu3 %v1985_v21  ;;  %v1557_v31 = vunpack.i.h.bf16 %v1555_v63  ;;  %v1556_v32 = vunpack.i.l.bf16 %v1555_v63 }
 0x9d6   :  { %v876_v29 = vpop.f32.mrf.mxu2 }
 0x9de   :  { %v878_v24 = vpop.f32.mrf.mxu2 }
 0xa2a   :  { %v861_v17 = vpop.f32.mrf.mxu0 }
 0xa2b   :  { %v877_v18 = vadd.f32 %v876_v29, %v861_v17 }
 0xa32   :  { %v863_v23 = vpop.f32.mrf.mxu0 }
 0xa33   :  { %v879_v2 = vadd.f32 %v878_v24, %v863_v23 }
 0xa42   :  { %v912_v20 = vpop.f32.mrf.mxu1 }
 0xa49   :  { %v893_v11 = vpop.f32.mrf.mxu3 }
 0xa4a   :  { %v898_v22 = vadd.f32 %v893_v11, %v877_v18  ;;  %v914_v30 = vpop.f32.mrf.mxu1 }
 0xa4c   :  { %v917_v27 = vadd.f32 %v912_v20, %v898_v22 }
 0xa4e   :  { %v919_v33 = vmul.f32 %v917_v27, %v1938_v1 }
 0xa50   :  { %v929_v34 = vsel %vm100_vm0, %v919_v33, %v1556_v32 }
 0xa51   :  { %v895_v28 = vpop.f32.mrf.mxu3 }
 0xa52   :  { %v899_v13 = vadd.f32 %v895_v28, %v879_v2 }
 0xa54   :  { %v918_v5 = vadd.f32 %v914_v30, %v899_v13 }
 0xa56   :  { %v920_v21 = vmul.f32 %v918_v5, %v1936_v56 }
 0xa58   :  { %v930_v35 = vsel %vm100_vm0, %v920_v21, %v1557_v31 }
 0xa59   :  { %v931_v36 = vpack.c.bf16 %v930_v35, %v929_v34 }
 0xa5b   :  { %1490 = vmatmul.msk.bf16.vlgmr.msrb.gmra.mxu0 %vm361_vm2, %v931_v36  ;;  %1491 = vmatmul.msk.bf16.vlgmr.msra.gmra.mxu2 %vm361_vm2, %v931_v36 }
 0xad8   :  { %v944_v26 = vpop.f32.mrf.mxu0 }
 0xad9   :  { %v2093_v38 = vadd.f32 %v944_v26, %v1952_v19 }
 0xadb   :  { %965 = vrot.lane.b32.xlu2 %v2093_v38, %s1789_s23 }
 0xade   :  { %v958_v40 = vpop.f32.mrf.mxu2 }
 0xadf   :  { %v959_v41 = vadd.f32 %v958_v40, %v1947_v16 }
 0xae0   :  { %v946_v42 = vpop.f32.mrf.mxu0 }
 0xae1   :  { %v2099_v44 = vadd.f32 %v946_v42, %v1952_v19  ;;  %1059 = vrot.lane.b32.xlu1 %v959_v41, %s1785_s20 }
 0xae3   :  { %967 = vrot.lane.b32.xlu0 %v2099_v44, %s1789_s23 }
 0xae6   :  { %v960_v46 = vpop.f32.mrf.mxu2 }
 0xae7   :  { %v961_v47 = vadd.f32 %v960_v46, %v1947_v16 }
 0xae9   :  { %1061 = vrot.lane.b32.xlu2 %v961_v47, %s1785_s20 }
 0xaf1   :  { %1013 = vrot.lane.b32.xlu2 %v959_v41, %s1789_s23 }
 0xb35   :  { %v966_v48 = vpop.permute.xlu2 %965 }
 0xb36   :  { %v971_v50 = vadd.f32 %v966_v48, %v2093_v38 }
 0xb38   :  { %v1492_v52 = vmul.f32 -1.442695, %v971_v50 }
 0xb3a   :  { %1604 = vpow2.f32 %v1492_v52 }
 0xb40   :  { %v1605_v53 = vpop.eup %1604 }
 0xb41   :  { %v979_v54 = vadd.f32 1.0, %v1605_v53 }
 0xb43   :  { %1606 = vrcp.f32 %v979_v54  ;;  %v992_v61 = vand.u32 2147483648, %v979_v54  ;;  %v990_v0 = vand.u32 2147483647, %v979_v54  ;;  %vm986_vm10 = vweird.f32 %v979_v54  ;;  %v1062_v28 = vpop.permute.xlu2 %1061 }
 0xb45   :  { %v993_v8 = vor.u32 1.1754944e-38, %v992_v61  ;;  %vm991_vm12 = vcmp.eq.f32.partialorder %v990_v0, 8.507059e+37 }
 0xb49   :  { %v1607_v55 = vpop.eup %1606 }
 0xb4a   :  { %v982_v59 = vmul.f32 %v1607_v55, %v979_v54  ;;  %vm987_vm9 = vweird.f32 %v1607_v55 }
 0xb4b   :  { %vm988_vm11 = vmor %vm986_vm10, %vm987_vm9  ;;  %v1014_v34 = vpop.permute.xlu2 %1013 }
 0xb4c   :  { %v983_v60 = vsub.f32 1.0, %v982_v59  ;;  %v1019_v36 = vadd.f32 %v1014_v34, %v2093_v38  ;;  %v1645_v34 = vld [vmem:[#allocation2 + $0x18] sm:$0xff] }
 0xb4e   :  { %v984_v62 = vmul.f32 %v1607_v55, %v983_v60  ;;  %v1494_v40 = vmul.f32 -1.442695, %v1019_v36 }
 0xb50   :  { %v985_v7 = vadd.f32 %v1607_v55, %v984_v62 }
 0xb52   :  { %v989_v3 = vsel %vm988_vm11, %v1607_v55, %v985_v7 }
 0xb53   :  { %v1060_v4 = vpop.permute.xlu1 %1059  ;;  %v994_v6 = vsel %vm991_vm12, %v993_v8, %v989_v3 }
 0xb54   :  { %v1065_v9 = vmul.f32 %v1060_v4, %v994_v6 }
 0xb55   :  { %v968_v10 = vpop.permute.xlu0 %967 }
 0xb56   :  { %v972_v12 = vadd.f32 %v968_v10, %v2099_v44  ;;  %1069 = vrot.lane.b32.xlu0 %v1065_v9, %s1777_s17 }
 0xb58   :  { %v1493_v25 = vmul.f32 -1.442695, %v972_v12 }
 0xb5a   :  { %1608 = vpow2.f32 %v1493_v25 }
 0xb5e   :  { %1015 = vrot.lane.b32.xlu0 %v961_v47, %s1789_s23 }
 0xb60   :  { %v1609_v14 = vpop.eup %1608 }
 0xb61   :  { %v980_v17 = vadd.f32 1.0, %v1609_v14 }
 0xb63   :  { %1610 = vrcp.f32 %v980_v17  ;;  %v1007_v11 = vand.u32 2147483648, %v980_v17  ;;  %v1005_v23 = vand.u32 2147483647, %v980_v17  ;;  %vm1001_vm14 = vweird.f32 %v980_v17 }
 0xb65   :  { %v1008_v2 = vor.u32 1.1754944e-38, %v1007_v11  ;;  %vm1006_vm3 = vcmp.eq.f32.partialorder %v1005_v23, 8.507059e+37 }
 0xb69   :  { %v1611_v29 = vpop.eup %1610 }
 0xb6a   :  { %v997_v18 = vmul.f32 %v1611_v29, %v980_v17  ;;  %vm1002_vm13 = vweird.f32 %v1611_v29 }
 0xb6b   :  { %vm1003_vm15 = vmor %vm1001_vm14, %vm1002_vm13 }
 0xb6c   :  { %v998_v20 = vsub.f32 1.0, %v997_v18 }
 0xb6e   :  { %v999_v22 = vmul.f32 %v1611_v29, %v998_v20 }
 0xb70   :  { %v1000_v24 = vadd.f32 %v1611_v29, %v999_v22 }
 0xb72   :  { %v1004_v27 = vsel %vm1003_vm15, %v1611_v29, %v1000_v24 }
 0xb73   :  { %v1009_v13 = vsel %vm1006_vm3, %v1008_v2, %v1004_v27 }
 0xb74   :  { %v1066_v63 = vmul.f32 %v1062_v28, %v1009_v13 }
 0xb76   :  { %1071 = vrot.lane.b32.xlu1 %v1066_v63, %s1777_s17 }
 0xbc8   :  { %v1070_v30 = vpop.permute.xlu0 %1069 }
 0xbc9   :  { %v1075_v33 = vadd.f32 %v1070_v30, %v2093_v38 }
 0xbcb   :  { %1612 = vtanh.f32 %v1075_v33 }
 0xbd0   :  { %v1016_v35 = vpop.permute.xlu0 %1015 }
 0xbd1   :  { %v1613_v5 = vpop.eup %1612  ;;  %v1020_v26 = vadd.f32 %v1016_v35, %v2099_v44 }
 0xbd2   :  { %1083 = vrot.lane.b32.xlu1 %v1613_v5, %s1785_s20 }
 0xbd3   :  { %v1495_v41 = vmul.f32 -1.442695, %v1020_v26 }
 0xbe8   :  { %v1072_v31 = vpop.permute.xlu1 %1071 }
 0xbe9   :  { %v1076_v32 = vadd.f32 %v1072_v31, %v2099_v44 }
 0xbeb   :  { %1614 = vtanh.f32 %v1076_v32  ;;  %v1644_v32 = vld [vmem:[#allocation2] sm:$0xff] }
 0xbec   :  { %1616 = vpow2.f32 %v1494_v40 }
 0xbed   :  { %1618 = vpow2.f32 %v1495_v41 }
 0xbf1   :  { %v1615_v21 = vpop.eup %1614 }
 0xbf2   :  { %1085 = vrot.lane.b32.xlu2 %v1615_v21, %s1785_s20  ;;  %v1617_v42 = vpop.eup %1616 }
 0xbf3   :  { %v1619_v46 = vpop.eup %1618  ;;  %v1027_v47 = vadd.f32 1.0, %v1617_v42 }
 0xbf4   :  { %v1028_v48 = vadd.f32 1.0, %v1619_v46 }
 0xbf5   :  { %1620 = vrcp.f32 %v1027_v47  ;;  %v1040_v44 = vand.u32 2147483648, %v1027_v47  ;;  %vm1034_vm5 = vweird.f32 %v1027_v47  ;;  %v1038_v62 = vand.u32 2147483647, %v1027_v47 }
 0xbf6   :  { %1622 = vrcp.f32 %v1028_v48  ;;  %v1055_v7 = vand.u32 2147483648, %v1028_v48  ;;  %vm1049_vm8 = vweird.f32 %v1028_v48  ;;  %v1053_v3 = vand.u32 2147483647, %v1028_v48 }
 0xbf7   :  { %v1041_v4 = vor.u32 1.1754944e-38, %v1040_v44  ;;  %vm1039_vm10 = vcmp.eq.f32.partialorder %v1038_v62, 8.507059e+37 }
 0xbf8   :  { %v1056_v10 = vor.u32 1.1754944e-38, %v1055_v7  ;;  %vm1054_vm11 = vcmp.eq.f32.partialorder %v1053_v3, 8.507059e+37 }
 0xbfb   :  { %v1621_v50 = vpop.eup %1620 }
 0xbfc   :  { %v1623_v52 = vpop.eup %1622  ;;  %v1030_v53 = vmul.f32 %v1621_v50, %v1027_v47  ;;  %vm1035_vm4 = vweird.f32 %v1621_v50 }
 0xbfd   :  { %v1045_v54 = vmul.f32 %v1623_v52, %v1028_v48  ;;  %vm1050_vm6 = vweird.f32 %v1623_v52  ;;  %vm1036_vm7 = vmor %vm1034_vm5, %vm1035_vm4 }
 0xbfe   :  { %v1031_v55 = vsub.f32 1.0, %v1030_v53  ;;  %vm1051_vm9 = vmor %vm1049_vm8, %vm1050_vm6 }
 0xbff   :  { %v1046_v59 = vsub.f32 1.0, %v1045_v54 }
 0xc00   :  { %v1032_v60 = vmul.f32 %v1621_v50, %v1031_v55 }
 0xc01   :  { %v1047_v38 = vmul.f32 %v1623_v52, %v1046_v59 }
 0xc02   :  { %v1033_v61 = vadd.f32 %v1621_v50, %v1032_v60 }
 0xc03   :  { %v1048_v0 = vadd.f32 %v1623_v52, %v1047_v38 }
 0xc04   :  { %v1037_v8 = vsel %vm1036_vm7, %v1621_v50, %v1033_v61 }
 0xc05   :  { %v1052_v6 = vsel %vm1051_vm9, %v1623_v52, %v1048_v0  ;;  %v1042_v9 = vsel %vm1039_vm10, %v1041_v4, %v1037_v8 }
 0xc06   :  { %v1057_v25 = vsel %vm1054_vm11, %v1056_v10, %v1052_v6  ;;  %v1079_v14 = vsub.f32 1.0, %v1042_v9  ;;  %v1091_v20 = vmul.f32 %v1042_v9, %v2054_v57 }
 0xc07   :  { %v1080_v29 = vsub.f32 1.0, %v1057_v25  ;;  %v1092_v11 = vmul.f32 %v1057_v25, %v2056_v58 }
 0xc44   :  { %v1084_v12 = vpop.permute.xlu1 %1083 }
 0xc45   :  { %v1089_v17 = vmul.f32 %v1084_v12, %v1079_v14 }
 0xc47   :  { %v2120_v23 = vadd.f32 %v1091_v20, %v1089_v17 }
 0xc4c   :  { %v1086_v18 = vpop.permute.xlu2 %1085 }
 0xc4d   :  { %v1090_v22 = vmul.f32 %v1086_v18, %v1080_v29 }
 0xc4f   :  { %v2122_v24 = vadd.f32 %v1092_v11, %v1090_v22 }
 0xc51   :  { %v1095_v2 = vpack.c.bf16 %v2122_v24, %v2120_v23 }
 0xc53   :  { %1097 = vrot.lane.b32.xlu0 %v1095_v2, %s1785_s20 }
 0xcc5   :  { %v1098_v27 = vpop.permute.xlu0 %1097 }
 0xcc6   :  { %1496 = vmatmul.msk.bf16.vlgmr.msrb.gmra.mxu3 %vm154_vm1, %v1098_v27 }
 0xd49   :  { %v1111_v28 = vpop.f32.mrf.mxu3 }
 0xd4a   :  { %v1112_v13 = vadd.f32 %v1893_v15, %v1111_v28 }
 0xd4c   :  { %v1116_v57 = vpack.c.bf16 %v1112_v13, %v1112_v13 }
 0xd4e   :  { %v1120_v33 = vunpack.c.l.b16 %v1116_v57 }
 0xd51   :  { %v1113_v63 = vpop.f32.mrf.mxu3 }
 0xd52   :  { %v1114_v58 = vadd.f32 %v1893_v15, %v1113_v63  ;;  %v1558_v15 = vpack.i.bf16 %v2122_v24, %v2120_v23 }
 0xd54   :  { %v1117_v30 = vpack.c.bf16 %v1114_v58, %v1114_v58 }
 0xd56   :  { %v1121_v5 = vunpack.c.l.b16 %v1117_v30 }
 0xd58   :  { %v1122_v31 = vpack.c.b16 %v1121_v5, %v1120_v33 }
 0xd5a   :  { %1123 = vrot.lane.b32.xlu0 %v1122_v31, %s1784_s2  ;;  %1174 = vrot.lane.b32.xlu2 %v1122_v31, %s1786_s6 }
 0xd5b   :  { %1155 = vrot.lane.b32.xlu1 %v1122_v31, %s1785_s20  ;;  %1148 = vmatpush.bf16.msra.mxu0 %v1122_v31 }
 0xd5e   :  { %1498 = vmatmul.msk.bf16.vlgmr.msra.gmra.mxu0 %vm100_vm0, %v1644_v32 }
 0xd5f   :  { %1228 = vmatpush.bf16.msrb.mxu0 %v1920_v39  ;;  %v1646_v39 = vld [vmem:[#allocation2 + $0x8] sm:$0xff] }
 0xd63   :  { %1229 = vmatpush.bf16.msrb.mxu0 %v1926_v45  ;;  %1559 = vrot.lane.b32.xlu1 %v1558_v15, %s1784_s2  ;;  %v1647_v45 = vld [vmem:[#allocation2 + $0x10] sm:$0xff] }
 0xd67   :  { %1230 = vmatpush.bf16.msrb.mxu0 %v1932_v51 }
 0xdb4   :  { %v1175_v21 = vpop.permute.xlu2 %1174 }
 0xdb5   :  { %1184 = vmatpush.bf16.msra.mxu3 %v1175_v21 }
 0xdb8   :  { %1500 = vmatmul.msk.bf16.vlgmr.msra.gmra.mxu3 %vm100_vm0, %v1645_v34 }
 0xdcc   :  { %v1124_v35 = vpop.permute.xlu0 %1123 }
 0xdcd   :  { %v1156_v36 = vpop.permute.xlu1 %1155  ;;  %1133 = vmatpush.bf16.msrb.mxu1 %v1124_v35 }
 0xdce   :  { %1165 = vmatpush.bf16.msrb.mxu2 %v1156_v36 }
 0xdd0   :  { %1497 = vmatmul.msk.bf16.vlgmr.msrb.gmra.mxu1 %vm100_vm0, %v1646_v39 }
 0xdd1   :  { %1214 = vmatpush.bf16.msra.mxu1 %v1918_v37  ;;  %1499 = vmatmul.msk.bf16.vlgmr.msrb.gmra.mxu2 %vm100_vm0, %v1647_v45 }
 0xdd5   :  { %1215 = vmatpush.bf16.msra.mxu1 %v1924_v43  ;;  %v1560_v54 = vpop.permute.xlu1 %1559 }
 0xdd6   :  { %v1562_v43 = vunpack.i.h.bf16 %v1560_v54  ;;  %v1561_v38 = vunpack.i.l.bf16 %v1560_v54 }
 0xdd9   :  { %1216 = vmatpush.bf16.msra.mxu1 %v1930_v49 }
 0xddb   :  { %v1150_v26 = vpop.f32.mrf.mxu0 }
 0xde3   :  { %v1152_v48 = vpop.f32.mrf.mxu0 }
 0xe3b   :  { %v1186_v42 = vpop.f32.mrf.mxu3 }
 0xe43   :  { %v1188_v55 = vpop.f32.mrf.mxu3 }
 0xe4d   :  { %v1135_v51 = vpop.f32.mrf.mxu1 }
 0xe4e   :  { %v1151_v40 = vadd.f32 %v1150_v26, %v1135_v51 }
 0xe54   :  { %v1167_v41 = vpop.f32.mrf.mxu2 }
 0xe55   :  { %v1172_v46 = vadd.f32 %v1167_v41, %v1151_v40  ;;  %v1137_v47 = vpop.f32.mrf.mxu1 }
 0xe56   :  { %v1153_v37 = vadd.f32 %v1152_v48, %v1137_v47 }
 0xe57   :  { %v1191_v50 = vadd.f32 %v1186_v42, %v1172_v46 }
 0xe59   :  { %v1193_v59 = vmul.f32 %v1191_v50, %v1938_v1 }
 0xe5b   :  { %v1203_v61 = vsel %vm100_vm0, %v1193_v59, %v1561_v38 }
 0xe5c   :  { %v1169_v52 = vpop.f32.mrf.mxu2 }
 0xe5d   :  { %v1173_v53 = vadd.f32 %v1169_v52, %v1153_v37 }
 0xe5f   :  { %v1192_v60 = vadd.f32 %v1188_v55, %v1173_v53 }
 0xe61   :  { %v1194_v49 = vmul.f32 %v1192_v60, %v1936_v56 }
 0xe63   :  { %v1204_v44 = vsel %vm100_vm0, %v1194_v49, %v1562_v43 }
 0xe64   :  { %v1205_v62 = vpack.c.bf16 %v1204_v44, %v1203_v61 }
 0xe66   :  { %1501 = vmatmul.msk.bf16.vlgmr.msra.gmra.mxu1 %vm361_vm2, %v1205_v62  ;;  %1502 = vmatmul.msk.bf16.vlgmr.msrb.gmra.mxu0 %vm361_vm2, %v1205_v62 }
 0xee3   :  { %v1218_v0 = vpop.f32.mrf.mxu1  ;;  %v1232_v7 = vpop.f32.mrf.mxu0 }
 0xee4   :  { %v2153_v8 = vadd.f32 %v1218_v0, %v1952_v19  ;;  %v1233_v1 = vadd.f32 %v1232_v7, %v1947_v16 }
 0xee6   :  { %1333 = vrot.lane.b32.xlu1 %v1233_v1, %s1785_s20  ;;  %1239 = vrot.lane.b32.xlu2 %v2153_v8, %s1789_s23 }
 0xeeb   :  { %v1220_v56 = vpop.f32.mrf.mxu1  ;;  %v1234_v3 = vpop.f32.mrf.mxu0 }
 0xeec   :  { %v2160_v4 = vadd.f32 %v1220_v56, %v1952_v19  ;;  %v1235_v6 = vadd.f32 %v1234_v3, %v1947_v16 }
 0xeee   :  { %1241 = vrot.lane.b32.xlu0 %v2160_v4, %s1789_s23  ;;  %1335 = vrot.lane.b32.xlu2 %v1235_v6, %s1785_s20 }
 0xef6   :  { %1287 = vrot.lane.b32.xlu2 %v1233_v1, %s1789_s23 }
 0xf40   :  { %v1240_v9 = vpop.permute.xlu2 %1239 }
 0xf41   :  { %v1245_v10 = vadd.f32 %v1240_v9, %v2153_v8 }
 0xf43   :  { %v1503_v12 = vmul.f32 -1.442695, %v1245_v10 }
 0xf45   :  { %1624 = vpow2.f32 %v1503_v12 }
 0xf48   :  { %v1336_v45 = vpop.permute.xlu2 %1335 }
 0xf4b   :  { %v1625_v25 = vpop.eup %1624 }
 0xf4c   :  { %v1253_v14 = vadd.f32 1.0, %v1625_v25 }
 0xf4e   :  { %1626 = vrcp.f32 %v1253_v14  ;;  %v1266_v18 = vand.u32 2147483648, %v1253_v14  ;;  %v1264_v20 = vand.u32 2147483647, %v1253_v14  ;;  %vm1260_vm2 = vweird.f32 %v1253_v14 }
 0xf50   :  { %v1267_v22 = vor.u32 1.1754944e-38, %v1266_v18  ;;  %vm1265_vm13 = vcmp.eq.f32.partialorder %v1264_v20, 8.507059e+37  ;;  %v1288_v50 = vpop.permute.xlu2 %1287 }
 0xf51   :  { %v1293_v37 = vadd.f32 %v1288_v50, %v2153_v8 }
 0xf53   :  { %v1505_v52 = vmul.f32 -1.442695, %v1293_v37 }
 0xf54   :  { %v1627_v17 = vpop.eup %1626 }
 0xf55   :  { %v1256_v19 = vmul.f32 %v1627_v17, %v1253_v14  ;;  %vm1261_vm0 = vweird.f32 %v1627_v17 }
 0xf56   :  { %vm1262_vm12 = vmor %vm1260_vm2, %vm1261_vm0 }
 0xf57   :  { %v1257_v29 = vsub.f32 1.0, %v1256_v19 }
 0xf58   :  { %v1334_v27 = vpop.permute.xlu1 %1333 }
 0xf59   :  { %v1258_v16 = vmul.f32 %v1627_v17, %v1257_v29 }
 0xf5b   :  { %v1259_v11 = vadd.f32 %v1627_v17, %v1258_v16 }
 0xf5d   :  { %v1263_v2 = vsel %vm1262_vm12, %v1627_v17, %v1259_v11 }
 0xf5e   :  { %v1268_v28 = vsel %vm1265_vm13, %v1267_v22, %v1263_v2 }
 0xf5f   :  { %v1339_v13 = vmul.f32 %v1334_v27, %v1268_v28 }
 0xf60   :  { %v1242_v63 = vpop.permute.xlu0 %1241 }
 0xf61   :  { %v1246_v57 = vadd.f32 %v1242_v63, %v2160_v4  ;;  %1343 = vrot.lane.b32.xlu0 %v1339_v13, %s1777_s17 }
 0xf63   :  { %v1504_v58 = vmul.f32 -1.442695, %v1246_v57 }
 0xf65   :  { %1628 = vpow2.f32 %v1504_v58 }
 0xf69   :  { %1289 = vrot.lane.b32.xlu0 %v1235_v6, %s1789_s23 }
 0xf6b   :  { %v1629_v30 = vpop.eup %1628 }
 0xf6c   :  { %v1254_v33 = vadd.f32 1.0, %v1629_v30 }
 0xf6e   :  { %1630 = vrcp.f32 %v1254_v33  ;;  %v1281_v15 = vand.u32 2147483648, %v1254_v33  ;;  %v1279_v34 = vand.u32 2147483647, %v1254_v33  ;;  %vm1275_vm15 = vweird.f32 %v1254_v33 }
 0xf70   :  { %v1282_v36 = vor.u32 1.1754944e-38, %v1281_v15  ;;  %vm1280_vm4 = vcmp.eq.f32.partialorder %v1279_v34, 8.507059e+37 }
 0xf74   :  { %v1631_v5 = vpop.eup %1630 }
 0xf75   :  { %v1271_v31 = vmul.f32 %v1631_v5, %v1254_v33  ;;  %vm1276_vm14 = vweird.f32 %v1631_v5 }
 0xf76   :  { %vm1277_vm3 = vmor %vm1275_vm15, %vm1276_vm14 }
 0xf77   :  { %v1272_v32 = vsub.f32 1.0, %v1271_v31 }
 0xf79   :  { %v1273_v21 = vmul.f32 %v1631_v5, %v1272_v32 }
 0xf7b   :  { %v1274_v35 = vadd.f32 %v1631_v5, %v1273_v21 }
 0xf7d   :  { %v1278_v39 = vsel %vm1277_vm3, %v1631_v5, %v1274_v35 }
 0xf7e   :  { %v1283_v51 = vsel %vm1280_vm4, %v1282_v36, %v1278_v39 }
 0xf7f   :  { %v1340_v26 = vmul.f32 %v1336_v45, %v1283_v51 }
 0xf81   :  { %1345 = vrot.lane.b32.xlu1 %v1340_v26, %s1777_s17  ;;  %s1790_s17 = smov [#allocation10]  }
 0xf82   :  { %s1383_s24 = sshll.u32 %s1790_s17, 4  ;;  %s1384_s24 = int_to_ptr.vmem [resolvable:$true] %s1383_s24 }
 0xfd3   :  { %v1344_v40 = vpop.permute.xlu0 %1343 }
 0xfd4   :  { %v1349_v41 = vadd.f32 %v1344_v40, %v2153_v8 }
 0xfd6   :  { %1632 = vtanh.f32 %v1349_v41 }
 0xfdb   :  { %v1290_v53 = vpop.permute.xlu0 %1289 }
 0xfdc   :  { %v1633_v42 = vpop.eup %1632  ;;  %v1294_v54 = vadd.f32 %v1290_v53, %v2160_v4 }
 0xfdd   :  { %1357 = vrot.lane.b32.xlu1 %v1633_v42, %s1785_s20 }
 0xfde   :  { %v1506_v55 = vmul.f32 -1.442695, %v1294_v54 }
 0xff3   :  { %v1346_v46 = vpop.permute.xlu1 %1345 }
 0xff4   :  { %v1350_v47 = vadd.f32 %v1346_v46, %v2160_v4 }
 0xff6   :  { %1634 = vtanh.f32 %v1350_v47 }
 0xff7   :  { %1636 = vpow2.f32 %v1505_v52 }
 0xff8   :  { %1638 = vpow2.f32 %v1506_v55 }
 0xffc   :  { %v1635_v48 = vpop.eup %1634 }
 0xffd   :  { %1359 = vrot.lane.b32.xlu2 %v1635_v48, %s1785_s20  ;;  %v1637_v59 = vpop.eup %1636 }
 0xffe   :  { %v1301_v60 = vadd.f32 1.0, %v1637_v59  ;;  %v1639_v43 = vpop.eup %1638 }
 0xfff   :  { %v1302_v38 = vadd.f32 1.0, %v1639_v43 }
0x1000   :  { %1640 = vrcp.f32 %v1301_v60  ;;  %v1314_v56 = vand.u32 2147483648, %v1301_v60  ;;  %vm1308_vm6 = vweird.f32 %v1301_v60  ;;  %v1312_v3 = vand.u32 2147483647, %v1301_v60 }
0x1001   :  { %1642 = vrcp.f32 %v1302_v38  ;;  %v1329_v25 = vand.u32 2147483648, %v1302_v38  ;;  %vm1323_vm10 = vweird.f32 %v1302_v38  ;;  %v1327_v17 = vand.u32 2147483647, %v1302_v38 }
0x1002   :  { %v1315_v9 = vor.u32 1.1754944e-38, %v1314_v56  ;;  %vm1313_vm8 = vcmp.eq.f32.partialorder %v1312_v3, 8.507059e+37 }
0x1003   :  { %v1330_v20 = vor.u32 1.1754944e-38, %v1329_v25  ;;  %vm1328_vm0 = vcmp.eq.f32.partialorder %v1327_v17, 8.507059e+37 }
0x1006   :  { %v1641_v49 = vpop.eup %1640 }
0x1007   :  { %v1304_v61 = vmul.f32 %v1641_v49, %v1301_v60  ;;  %v1643_v62 = vpop.eup %1642  ;;  %vm1309_vm5 = vweird.f32 %v1641_v49 }
0x1008   :  { %v1319_v7 = vmul.f32 %v1643_v62, %v1302_v38  ;;  %vm1310_vm7 = vmor %vm1308_vm6, %vm1309_vm5  ;;  %vm1324_vm9 = vweird.f32 %v1643_v62 }
0x1009   :  { %v1305_v44 = vsub.f32 1.0, %v1304_v61  ;;  %vm1325_vm11 = vmor %vm1323_vm10, %vm1324_vm9 }
0x100a   :  { %v1320_v1 = vsub.f32 1.0, %v1319_v7 }
0x100b   :  { %v1306_v0 = vmul.f32 %v1641_v49, %v1305_v44 }
0x100c   :  { %v1321_v6 = vmul.f32 %v1643_v62, %v1320_v1 }
0x100d   :  { %v1307_v8 = vadd.f32 %v1641_v49, %v1306_v0 }
0x100e   :  { %v1322_v12 = vadd.f32 %v1643_v62, %v1321_v6 }
0x100f   :  { %v1311_v4 = vsel %vm1310_vm7, %v1641_v49, %v1307_v8 }
0x1010   :  { %v1316_v10 = vsel %vm1313_vm8, %v1315_v9, %v1311_v4  ;;  %v1326_v16 = vsel %vm1325_vm11, %v1643_v62, %v1322_v12 }
0x1011   :  { %v1353_v14 = vsub.f32 1.0, %v1316_v10  ;;  %v1365_v18 = vmul.f32 %v1316_v10, %v2120_v23  ;;  %v1331_v22 = vsel %vm1328_vm0, %v1330_v20, %v1326_v16 }
0x1012   :  { %v1354_v2 = vsub.f32 1.0, %v1331_v22  ;;  %v1366_v28 = vmul.f32 %v1331_v22, %v2122_v24 }
0x104f   :  { %v1358_v19 = vpop.permute.xlu1 %1357 }
0x1050   :  { %v1363_v29 = vmul.f32 %v1358_v19, %v1353_v14 }
0x1052   :  { %v1367_v11 = vadd.f32 %v1365_v18, %v1363_v29 }
0x1054   :  { %1371 = vrot.lane.b32.xlu0 %v1367_v11, %s1785_s20 }
0x1057   :  { %v1360_v27 = vpop.permute.xlu2 %1359 }
0x1058   :  { %v1364_v13 = vmul.f32 %v1360_v27, %v1354_v2 }
0x105a   :  { %v1368_v63 = vadd.f32 %v1366_v28, %v1364_v13 }
0x105c   :  { %1373 = vrot.lane.b32.xlu1 %v1368_v63, %s1785_s20 }
0x10c6   :  { %v1372_v57 = vpop.permute.xlu0 %1371 }
0x10c7   :  { %1377 = vst.msk [vmem:[#allocation10] sm:$0xff] %vm154_vm1, %v1372_v57 }
0x10ce   :  { %v1374_v23 = vpop.permute.xlu1 %1373 }
0x10cf   :  { %1378 = vst.msk [vmem:[#allocation10 + $0x8] sm:$0xff] %vm154_vm1, %v1374_v23 }
0x10d0   :  { %1391 = dma.vmem_to_hbm [thread:$0]  %s1384_s24, 256, %s1386_s26, [#allocation6], %s1780_s21, %s1780_s21, %s1781_s5  }
0x10d1   :  { %1774 = dma.done.wait [#allocation6], 256  }
0x10d2   :  { %1775 = vsyncadd [#allocation6], 4294967040 }
0x10d3   :  { %1396 = vsyncpa [#allocation5], 1 }
0x10d4   :  { %1397 = vsyncpa [#allocation8], 1 }
0x10d5   :  { %1398 = vsyncpa [#allocation6], 1 }
0x10d6   :  { %1399 = vsyncmov [#allocation3] }
0x10d9   :  { %s1400_s27 = vpop.sfrf %1399 }
0x10da   :  { %p1507_p0 = scmp.ne.s32.totalorder %s1400_s27, 0 }
0x10dc   :  { %1404 = shalt.err (%p1507_p0)  }

</bundles_post_ra>
